<compile_context>
chip_gen: v7x
topology: tpu7x:2x2x1
jax: 0.10.0
libtpu: 0.0.40
codegen_flags: <defaults>
</compile_context>

<pallas_src>
import functools

import jax
import jax.numpy as jnp
from jax.experimental import pallas as pl
from jax.experimental.pallas import tpu as pltpu


def _leaky_relu(v):
    # nn.LeakyReLU(0.1)
    return jnp.where(v >= 0, v, 0.1 * v)


def _layer_norm(v, gamma, beta, eps=1e-5):
    mu = jnp.mean(v, axis=-1, keepdims=True)
    var = jnp.mean((v - mu) ** 2, axis=-1, keepdims=True)
    return (v - mu) * jax.lax.rsqrt(var + eps) * gamma + beta


def graph_model_kernel(
    x_ref, a_ref, seg_ref, whid_ref, wfc_ref, wp2_ref, vec_ref,   # inputs
    out_ref, rep_ref,                                             # outputs
    *, hidden, attn_features, n_heads, out_features,
    graphs_per_block, nodes,
):
    f32 = jnp.float32
    bf16 = jnp.bfloat16
    gb = graphs_per_block
    n = nodes

    x = x_ref[...]           # (M, F)   bf16, M = gb * n
    a = a_ref[0]             # (M, M)   bf16 block-diagonal adjacency
    seg = seg_ref[...]       # (gb, M)  bf16 per-graph segment-sum matrix

    # Weight slab: [w1 | w2 | wp1 | wf] along lanes (static lane-slice loads).
    w1 = whid_ref[:, :hidden]
    w2 = whid_ref[:, hidden:2 * hidden]
    wp1 = whid_ref[:, 2 * hidden:2 * hidden + attn_features]
    wf = whid_ref[:, 2 * hidden + attn_features:
                  2 * hidden + attn_features + out_features]
    w_fc = wfc_ref[...]      # (F, H)  bf16
    wp2 = wp2_ref[...]       # (A, NH) bf16

    # Row-vector slab: biases / LN affine params, f32.
    b_fc = vec_ref[0:1, :hidden]
    b1 = vec_ref[1:2, :hidden]
    g1 = vec_ref[2:3, :hidden]
    be1 = vec_ref[3:4, :hidden]
    b2 = vec_ref[4:5, :hidden]
    g2 = vec_ref[5:6, :hidden]
    be2 = vec_ref[6:7, :hidden]
    bp1 = vec_ref[7:8, :attn_features]
    bp2 = vec_ref[8:9, :n_heads]
    b_f = vec_ref[9:10, :out_features]

    # h = fc(x);  h0 = h
    h0 = jnp.dot(x, w_fc, preferred_element_type=f32) + b_fc         # (M, H) f32

    # conv1: aggregate (A @ h), linear, LeakyReLU, LayerNorm
    agg1 = jnp.dot(a, h0.astype(bf16), preferred_element_type=f32)
    z1 = jnp.dot(agg1.astype(bf16), w1, preferred_element_type=f32) + b1
    h1 = _layer_norm(_leaky_relu(z1), g1, be1)

    # conv2 + residual: h2 = h1 + LN(LeakyReLU(conv2(h1)))
    agg2 = jnp.dot(a, h1.astype(bf16), preferred_element_type=f32)
    z2 = jnp.dot(agg2.astype(bf16), w2, preferred_element_type=f32) + b2
    h2 = h1 + _layer_norm(_leaky_relu(z2), g2, be2)                   # f_rep

    # AttnPooling: heads = fc2(tanh(fc1(h2))); softmax over nodes per graph.
    h2b = h2.astype(bf16)
    t = jnp.tanh(jnp.dot(h2b, wp1, preferred_element_type=f32) + bp1)     # (M, A)
    heads = jnp.dot(t.astype(bf16), wp2, preferred_element_type=f32) + bp2  # (M, NH)

    heads3 = heads.reshape(gb, n, n_heads)
    m = jnp.max(heads3, axis=1, keepdims=True)
    e = jnp.exp(heads3 - m)
    denom = jnp.sum(e, axis=1, keepdims=True)
    attn3 = e * pl.reciprocal(denom, approx=True)                     # (gb, n, NH)

    # mean over heads commutes with the per-head weighted node sums, so the
    # whole multi-head pooling collapses to one segment-sum matmul:
    #   mean_k sum_n attn[g,n,k] * h2[g,n,:] = sum_n abar[g,n] * h2[g,n,:]
    abar = jnp.mean(attn3, axis=-1, keepdims=True).reshape(gb * n, 1)  # (M, 1)
    pooled = jnp.dot(seg, (abar * h2).astype(bf16),
                     preferred_element_type=f32)                       # (gb, H)

    # Final linear -> one (gb, OUT) store per step.
    out = jnp.dot(pooled.astype(bf16), wf, preferred_element_type=f32) + b_f
    out_ref[0] = out.astype(out_ref.dtype)

    # Combined rep slab [h0 | f_rep]: two static lane-slice stores (no concat).
    rep_ref[:, :hidden] = h0.astype(rep_ref.dtype)
    rep_ref[:, hidden:] = h2.astype(rep_ref.dtype)


def _pack_params(params, *, hidden, attn_features, n_heads, out_features):
    """Pack the many tiny parameter tensors into a few dense operands."""
    w_hid = jnp.concatenate(
        [params["w1"], params["w2"], params["wp1"], params["wf"]], axis=1
    ).astype(jnp.bfloat16)                              # (H, 2H + A + OUT)
    w_fc = params["w_fc"].astype(jnp.bfloat16)          # (F, H)
    wp2 = params["wp2"].astype(jnp.bfloat16)            # (A, NH)

    vw = max(hidden, attn_features, n_heads, out_features)

    def row(v):
        v = v.reshape(1, -1).astype(jnp.float32)
        return jnp.pad(v, ((0, 0), (0, vw - v.shape[1])))

    rows = [params["b_fc"], params["b1"], params["g1"], params["be1"],
            params["b2"], params["g2"], params["be2"],
            params["bp1"], params["bp2"], params["bf"]]
    vecs = jnp.concatenate([row(v) for v in rows], axis=0)
    vecs = jnp.pad(vecs, ((0, 16 - vecs.shape[0]), (0, 0)))   # (16, VW) f32
    return w_hid, w_fc, wp2, vecs


def graph_model_forward(x, adj, params, *, num_blocks=1):
    """Batched GraphModel.forward. Returns (output, input, f_rep, h0).

    num_blocks=1 (single grid step) is best on v5e/v6e; pass num_blocks=2 on
    v7x so both TensorCores get half the graphs.
    """
    B, N, F = x.shape
    hidden = params["w_fc"].shape[1]
    attn_features = params["wp1"].shape[1]
    n_heads = params["wp2"].shape[1]
    out_features = params["wf"].shape[1]

    assert B % num_blocks == 0
    gb = B // num_blocks          # graphs per grid step
    mb = gb * N                   # node rows per grid step
    M = B * N

    w_hid, w_fc, wp2, vecs = _pack_params(
        params, hidden=hidden, attn_features=attn_features,
        n_heads=n_heads, out_features=out_features)

    # Flatten node features and build per-block block-diagonal adjacencies.
    x_flat = x.reshape(M, F).astype(jnp.bfloat16)                     # (M, F)
    eye_g = jnp.eye(gb, dtype=adj.dtype)
    adj_bd = jnp.einsum(
        "gc,kgij->kgicj", eye_g, adj.reshape(num_blocks, gb, N, N)
    ).reshape(num_blocks, mb, mb).astype(jnp.bfloat16)                # block-diag
    # Segment-sum matrix: seg[g, g*N + n] = 1 (same for every block).
    seg = jnp.repeat(jnp.eye(gb, dtype=jnp.float32), N, axis=1).astype(jnp.bfloat16)

    kernel = functools.partial(
        graph_model_kernel, hidden=hidden, attn_features=attn_features,
        n_heads=n_heads, out_features=out_features,
        graphs_per_block=gb, nodes=N)

    out_shapes = (
        jax.ShapeDtypeStruct((num_blocks, gb, out_features), jnp.float32),  # output
        jax.ShapeDtypeStruct((M, 2 * hidden), jnp.float32),                 # [h0|f_rep]
    )

    flops = num_blocks * (
        2 * mb * (F * hidden + 2 * mb * hidden + 2 * hidden * hidden
                  + hidden * attn_features + attn_features * n_heads)
        + 2 * gb * mb * hidden + 2 * gb * hidden * out_features)
    transcendentals = num_blocks * mb * (attn_features + n_heads + 2)
    bytes_accessed = (x_flat.size * 2 + adj_bd.size * 2 + seg.size * 2
                      + w_hid.size * 2 + w_fc.size * 2 + wp2.size * 2
                      + vecs.size * 4 + M * 2 * hidden * 4
                      + B * out_features * 4)

    out, reps = pl.pallas_call(
        kernel,
        grid=(num_blocks,),
        in_specs=[
            pl.BlockSpec((mb, F), lambda g: (g, 0)),          # node features
            pl.BlockSpec((1, mb, mb), lambda g: (g, 0, 0)),   # block-diag adjacency
            # Constant index maps: DMA'd once, VMEM-resident across the grid.
            pl.BlockSpec(seg.shape, lambda g: (0, 0)),
            pl.BlockSpec(w_hid.shape, lambda g: (0, 0)),
            pl.BlockSpec(w_fc.shape, lambda g: (0, 0)),
            pl.BlockSpec(wp2.shape, lambda g: (0, 0)),
            pl.BlockSpec(vecs.shape, lambda g: (0, 0)),
        ],
        out_specs=(
            pl.BlockSpec((1, gb, out_features), lambda g: (g, 0, 0)),
            pl.BlockSpec((mb, 2 * hidden), lambda g: (g, 0)),
        ),
        out_shape=out_shapes,
        compiler_params=pltpu.CompilerParams(
            dimension_semantics=("parallel",)),
        cost_estimate=pl.CostEstimate(
            flops=int(flops), transcendentals=int(transcendentals),
            bytes_accessed=int(bytes_accessed)),
    )(x_flat, adj_bd, seg, w_hid, w_fc, wp2, vecs)

    output = out.reshape(B, out_features)
    h0 = reps[:, :hidden].reshape(B, N, hidden)
    f_rep = reps[:, hidden:].reshape(B, N, hidden)
    return output, x, f_rep, h0


def init_params(key, in_features, hidden, attn_features, n_heads, out_features):
    ks = jax.random.split(key, 12)

    def lin(k, fan_in, fan_out):
        bound = 1.0 / jnp.sqrt(jnp.float32(fan_in))
        kw, kb = jax.random.split(k)
        w = jax.random.uniform(kw, (fan_in, fan_out), jnp.float32, -bound, bound)
        b = jax.random.uniform(kb, (1, fan_out), jnp.float32, -bound, bound)
        return w, b

    p = {}
    p["w_fc"], p["b_fc"] = lin(ks[0], in_features, hidden)
    # GraphConvolution uses stdv = 1/sqrt(out_features)
    gstd = 1.0 / jnp.sqrt(jnp.float32(hidden))
    p["w1"] = jax.random.uniform(ks[1], (hidden, hidden), jnp.float32, -gstd, gstd)
    p["b1"] = jax.random.uniform(ks[2], (1, hidden), jnp.float32, -gstd, gstd)
    p["w2"] = jax.random.uniform(ks[3], (hidden, hidden), jnp.float32, -gstd, gstd)
    p["b2"] = jax.random.uniform(ks[4], (1, hidden), jnp.float32, -gstd, gstd)
    # LayerNorm affine params
    p["g1"], p["be1"] = jnp.ones((1, hidden), jnp.float32), jnp.zeros((1, hidden), jnp.float32)
    p["g2"], p["be2"] = jnp.ones((1, hidden), jnp.float32), jnp.zeros((1, hidden), jnp.float32)
    # AttnPooling (only `pooling` feeds the returned output; pooling_0 is dead code)
    p["wp1"], p["bp1"] = lin(ks[5], hidden, attn_features)
    p["wp2"], p["bp2"] = lin(ks[6], attn_features, n_heads)
    # final fc
    p["wf"], p["bf"] = lin(ks[7], hidden, out_features)
    return p


if __name__ == "__main__":
    key = jax.random.PRNGKey(0)
    k_x, k_a, k_m, k_p = jax.random.split(key, 4)

    B = 8                # graphs per batch (all processed in one grid step)
    N = 16               # nodes per graph  -> B*N = 128 matmul rows
    IN_FEATURES = 8
    HIDDEN = 32
    ATTN_FEATURES = 16
    N_HEADS = 4
    OUT_FEATURES = 4

    # node features and weighted adjacency (adj[b,dst,src] = edge weight, ~50% density)
    x = jax.random.normal(k_x, (B, N, IN_FEATURES), jnp.float32)
    weights = jax.random.uniform(k_a, (B, N, N), jnp.float32)
    mask = (jax.random.uniform(k_m, (B, N, N)) < 0.5).astype(jnp.float32)
    adj = weights * mask

    params = init_params(k_p, IN_FEATURES, HIDDEN, ATTN_FEATURES, N_HEADS, OUT_FEATURES)

    # num_blocks=1: single grid step (best on v5e/v6e; use num_blocks=2 on v7x).
    fwd = jax.jit(functools.partial(graph_model_forward, num_blocks=1))
    output, inp, f_rep, h0 = fwd(x, adj, params)
    jax.block_until_ready((output, inp, f_rep, h0))

    assert output.shape == (B, OUT_FEATURES)
    assert inp.shape == (B, N, IN_FEATURES)
    assert f_rep.shape == (B, N, HIDDEN)
    assert h0.shape == (B, N, HIDDEN)
    assert bool(jnp.all(jnp.isfinite(output)))
    assert bool(jnp.all(jnp.isfinite(f_rep)))
    print("KERNEL_OK")
</pallas_src>

<mosaic_0001>
module attributes {stable_mosaic.version = 11 : i64} {
  func.func @graph_model_kernel(%arg0: i32, %arg1: memref<128x8xbf16, #tpu.memory_space<vmem>>, %arg2: memref<1x128x128xbf16, #tpu.memory_space<vmem>>, %arg3: memref<8x128xbf16, #tpu.memory_space<vmem>>, %arg4: memref<32x84xbf16, #tpu.memory_space<vmem>>, %arg5: memref<8x32xbf16, #tpu.memory_space<vmem>>, %arg6: memref<16x4xbf16, #tpu.memory_space<vmem>>, %arg7: memref<16x32xf32, #tpu.memory_space<vmem>>, %arg8: memref<1x8x4xf32, #tpu.memory_space<vmem>>, %arg9: memref<128x64xf32, #tpu.memory_space<vmem>>) attributes {dimension_semantics = [#tpu.dimension_semantics<parallel>], iteration_bounds = array<i64: 1>, scalar_prefetch = 0 : i64, scratch_operands = 0 : i64, tpu.core_type = #tpu.core_type<tc>, window_params = [{transform_indices = @transform_0, window_bounds = array<i64: 128, 8>}, {transform_indices = @transform_1, window_bounds = array<i64: 1, 128, 128>}, {pipeline_mode = #tpu.pipeline_mode<synchronous>, transform_indices = @transform_2, window_bounds = array<i64: 8, 128>}, {pipeline_mode = #tpu.pipeline_mode<synchronous>, transform_indices = @transform_3, window_bounds = array<i64: 32, 84>}, {pipeline_mode = #tpu.pipeline_mode<synchronous>, transform_indices = @transform_4, window_bounds = array<i64: 8, 32>}, {pipeline_mode = #tpu.pipeline_mode<synchronous>, transform_indices = @transform_5, window_bounds = array<i64: 16, 4>}, {pipeline_mode = #tpu.pipeline_mode<synchronous>, transform_indices = @transform_6, window_bounds = array<i64: 16, 32>}, {transform_indices = @transform_7, window_bounds = array<i64: 1, 8, 4>}, {transform_indices = @transform_8, window_bounds = array<i64: 128, 64>}]} {
    %c0 = arith.constant 0 : index
    %c0_0 = arith.constant 0 : index
    %0 = vector.load %arg1[%c0, %c0_0] : memref<128x8xbf16, #tpu.memory_space<vmem>>, vector<128x8xbf16>
    %c0_1 = arith.constant 0 : index
    %c0_2 = arith.constant 0 : index
    %c0_3 = arith.constant 0 : index
    %1 = vector.load %arg2[%c0_1, %c0_2, %c0_3] : memref<1x128x128xbf16, #tpu.memory_space<vmem>>, vector<1x128x128xbf16>
    %2 = vector.shape_cast %1 : vector<1x128x128xbf16> to vector<128x128xbf16>
    %c0_4 = arith.constant 0 : index
    %c0_5 = arith.constant 0 : index
    %3 = vector.load %arg3[%c0_4, %c0_5] : memref<8x128xbf16, #tpu.memory_space<vmem>>, vector<8x128xbf16>
    %c0_6 = arith.constant 0 : index
    %c0_7 = arith.constant 0 : index
    %4 = vector.load %arg4[%c0_6, %c0_7] : memref<32x84xbf16, #tpu.memory_space<vmem>>, vector<32x32xbf16>
    %c0_8 = arith.constant 0 : index
    %c32 = arith.constant 32 : index
    %5 = vector.load %arg4[%c0_8, %c32] : memref<32x84xbf16, #tpu.memory_space<vmem>>, vector<32x32xbf16>
    %c0_9 = arith.constant 0 : index
    %c64 = arith.constant 64 : index
    %6 = vector.load %arg4[%c0_9, %c64] : memref<32x84xbf16, #tpu.memory_space<vmem>>, vector<32x16xbf16>
    %c0_10 = arith.constant 0 : index
    %c80 = arith.constant 80 : index
    %7 = vector.load %arg4[%c0_10, %c80] : memref<32x84xbf16, #tpu.memory_space<vmem>>, vector<32x4xbf16>
    %c0_11 = arith.constant 0 : index
    %c0_12 = arith.constant 0 : index
    %8 = vector.load %arg5[%c0_11, %c0_12] : memref<8x32xbf16, #tpu.memory_space<vmem>>, vector<8x32xbf16>
    %c0_13 = arith.constant 0 : index
    %c0_14 = arith.constant 0 : index
    %9 = vector.load %arg6[%c0_13, %c0_14] : memref<16x4xbf16, #tpu.memory_space<vmem>>, vector<16x4xbf16>
    %c0_15 = arith.constant 0 : index
    %c0_16 = arith.constant 0 : index
    %10 = vector.load %arg7[%c0_15, %c0_16] : memref<16x32xf32, #tpu.memory_space<vmem>>, vector<1x32xf32>
    %c1 = arith.constant 1 : index
    %c0_17 = arith.constant 0 : index
    %11 = vector.load %arg7[%c1, %c0_17] : memref<16x32xf32, #tpu.memory_space<vmem>>, vector<1x32xf32>
    %c2 = arith.constant 2 : index
    %c0_18 = arith.constant 0 : index
    %12 = vector.load %arg7[%c2, %c0_18] : memref<16x32xf32, #tpu.memory_space<vmem>>, vector<1x32xf32>
    %c3 = arith.constant 3 : index
    %c0_19 = arith.constant 0 : index
    %13 = vector.load %arg7[%c3, %c0_19] : memref<16x32xf32, #tpu.memory_space<vmem>>, vector<1x32xf32>
    %c4 = arith.constant 4 : index
    %c0_20 = arith.constant 0 : index
    %14 = vector.load %arg7[%c4, %c0_20] : memref<16x32xf32, #tpu.memory_space<vmem>>, vector<1x32xf32>
    %c5 = arith.constant 5 : index
    %c0_21 = arith.constant 0 : index
    %15 = vector.load %arg7[%c5, %c0_21] : memref<16x32xf32, #tpu.memory_space<vmem>>, vector<1x32xf32>
    %c6 = arith.constant 6 : index
    %c0_22 = arith.constant 0 : index
    %16 = vector.load %arg7[%c6, %c0_22] : memref<16x32xf32, #tpu.memory_space<vmem>>, vector<1x32xf32>
    %c7 = arith.constant 7 : index
    %c0_23 = arith.constant 0 : index
    %17 = vector.load %arg7[%c7, %c0_23] : memref<16x32xf32, #tpu.memory_space<vmem>>, vector<1x16xf32>
    %c8 = arith.constant 8 : index
    %c0_24 = arith.constant 0 : index
    %18 = vector.load %arg7[%c8, %c0_24] : memref<16x32xf32, #tpu.memory_space<vmem>>, vector<1x4xf32>
    %c9 = arith.constant 9 : index
    %c0_25 = arith.constant 0 : index
    %19 = vector.load %arg7[%c9, %c0_25] : memref<16x32xf32, #tpu.memory_space<vmem>>, vector<1x4xf32>
    %cst = arith.constant dense<0.000000e+00> : vector<128x32xf32>
    %20 = tpu.matmul %0, %8, %cst {dimension_numbers = #tpu.dot_dimension_numbers<[1], [0], [0], [1], [0, 0, 1, 1], [], []>} : vector<128x8xbf16>, vector<8x32xbf16>, vector<128x32xf32> -> vector<128x32xf32>
    %21 = vector.broadcast %10 : vector<1x32xf32> to vector<128x32xf32>
    %22 = arith.addf %20, %21 : vector<128x32xf32>
    %23 = arith.truncf %22 : vector<128x32xf32> to vector<128x32xbf16>
    %cst_26 = arith.constant dense<0.000000e+00> : vector<128x32xf32>
    %24 = tpu.matmul %2, %23, %cst_26 {dimension_numbers = #tpu.dot_dimension_numbers<[1], [0], [0], [1], [0, 0, 1, 1], [], []>} : vector<128x128xbf16>, vector<128x32xbf16>, vector<128x32xf32> -> vector<128x32xf32>
    %25 = arith.truncf %24 : vector<128x32xf32> to vector<128x32xbf16>
    %cst_27 = arith.constant dense<0.000000e+00> : vector<128x32xf32>
    %26 = tpu.matmul %25, %4, %cst_27 {dimension_numbers = #tpu.dot_dimension_numbers<[1], [0], [0], [1], [0, 0, 1, 1], [], []>} : vector<128x32xbf16>, vector<32x32xbf16>, vector<128x32xf32> -> vector<128x32xf32>
    %27 = vector.broadcast %11 : vector<1x32xf32> to vector<128x32xf32>
    %28 = arith.addf %26, %27 : vector<128x32xf32>
    %cst_28 = arith.constant 0.000000e+00 : f32
    %29 = vector.broadcast %cst_28 : f32 to vector<128x32xf32>
    %30 = arith.cmpf oge, %28, %29 : vector<128x32xf32>
    %cst_29 = arith.constant 1.000000e-01 : f32
    %31 = vector.broadcast %cst_29 : f32 to vector<128x32xf32>
    %32 = arith.mulf %31, %28 : vector<128x32xf32>
    %33 = arith.select %30, %28, %32 : vector<128x32xi1>, vector<128x32xf32>
    %cst_30 = arith.constant dense<0.000000e+00> : vector<128xf32>
    %34 = vector.multi_reduction <add>, %33, %cst_30 [1] : vector<128x32xf32> to vector<128xf32>
    %35 = vector.shape_cast %34 : vector<128xf32> to vector<128x1xf32>
    %cst_31 = arith.constant 3.200000e+01 : f32
    %36 = vector.broadcast %cst_31 : f32 to vector<128x1xf32>
    %37 = arith.divf %35, %36 : vector<128x1xf32>
    %38 = vector.broadcast %37 : vector<128x1xf32> to vector<128x32xf32>
    %39 = arith.subf %33, %38 : vector<128x32xf32>
    %40 = arith.mulf %39, %39 : vector<128x32xf32>
    %cst_32 = arith.constant dense<0.000000e+00> : vector<128xf32>
    %41 = vector.multi_reduction <add>, %40, %cst_32 [1] : vector<128x32xf32> to vector<128xf32>
    %42 = vector.shape_cast %41 : vector<128xf32> to vector<128x1xf32>
    %cst_33 = arith.constant 3.200000e+01 : f32
    %43 = vector.broadcast %cst_33 : f32 to vector<128x1xf32>
    %44 = arith.divf %42, %43 : vector<128x1xf32>
    %45 = vector.broadcast %37 : vector<128x1xf32> to vector<128x32xf32>
    %46 = arith.subf %33, %45 : vector<128x32xf32>
    %cst_34 = arith.constant 9.99999974E-6 : f32
    %47 = vector.broadcast %cst_34 : f32 to vector<128x1xf32>
    %48 = arith.addf %44, %47 : vector<128x1xf32>
    %49 = math.rsqrt %48 : vector<128x1xf32>
    %50 = vector.broadcast %49 : vector<128x1xf32> to vector<128x32xf32>
    %51 = arith.mulf %46, %50 : vector<128x32xf32>
    %52 = vector.broadcast %12 : vector<1x32xf32> to vector<128x32xf32>
    %53 = arith.mulf %51, %52 : vector<128x32xf32>
    %54 = vector.broadcast %13 : vector<1x32xf32> to vector<128x32xf32>
    %55 = arith.addf %53, %54 : vector<128x32xf32>
    %56 = arith.truncf %55 : vector<128x32xf32> to vector<128x32xbf16>
    %cst_35 = arith.constant dense<0.000000e+00> : vector<128x32xf32>
    %57 = tpu.matmul %2, %56, %cst_35 {dimension_numbers = #tpu.dot_dimension_numbers<[1], [0], [0], [1], [0, 0, 1, 1], [], []>} : vector<128x128xbf16>, vector<128x32xbf16>, vector<128x32xf32> -> vector<128x32xf32>
    %58 = arith.truncf %57 : vector<128x32xf32> to vector<128x32xbf16>
    %cst_36 = arith.constant dense<0.000000e+00> : vector<128x32xf32>
    %59 = tpu.matmul %58, %5, %cst_36 {dimension_numbers = #tpu.dot_dimension_numbers<[1], [0], [0], [1], [0, 0, 1, 1], [], []>} : vector<128x32xbf16>, vector<32x32xbf16>, vector<128x32xf32> -> vector<128x32xf32>
    %60 = vector.broadcast %14 : vector<1x32xf32> to vector<128x32xf32>
    %61 = arith.addf %59, %60 : vector<128x32xf32>
    %cst_37 = arith.constant 0.000000e+00 : f32
    %62 = vector.broadcast %cst_37 : f32 to vector<128x32xf32>
    %63 = arith.cmpf oge, %61, %62 : vector<128x32xf32>
    %cst_38 = arith.constant 1.000000e-01 : f32
    %64 = vector.broadcast %cst_38 : f32 to vector<128x32xf32>
    %65 = arith.mulf %64, %61 : vector<128x32xf32>
    %66 = arith.select %63, %61, %65 : vector<128x32xi1>, vector<128x32xf32>
    %cst_39 = arith.constant dense<0.000000e+00> : vector<128xf32>
    %67 = vector.multi_reduction <add>, %66, %cst_39 [1] : vector<128x32xf32> to vector<128xf32>
    %68 = vector.shape_cast %67 : vector<128xf32> to vector<128x1xf32>
    %cst_40 = arith.constant 3.200000e+01 : f32
    %69 = vector.broadcast %cst_40 : f32 to vector<128x1xf32>
    %70 = arith.divf %68, %69 : vector<128x1xf32>
    %71 = vector.broadcast %70 : vector<128x1xf32> to vector<128x32xf32>
    %72 = arith.subf %66, %71 : vector<128x32xf32>
    %73 = arith.mulf %72, %72 : vector<128x32xf32>
    %cst_41 = arith.constant dense<0.000000e+00> : vector<128xf32>
    %74 = vector.multi_reduction <add>, %73, %cst_41 [1] : vector<128x32xf32> to vector<128xf32>
    %75 = vector.shape_cast %74 : vector<128xf32> to vector<128x1xf32>
    %cst_42 = arith.constant 3.200000e+01 : f32
    %76 = vector.broadcast %cst_42 : f32 to vector<128x1xf32>
    %77 = arith.divf %75, %76 : vector<128x1xf32>
    %78 = vector.broadcast %70 : vector<128x1xf32> to vector<128x32xf32>
    %79 = arith.subf %66, %78 : vector<128x32xf32>
    %cst_43 = arith.constant 9.99999974E-6 : f32
    %80 = vector.broadcast %cst_43 : f32 to vector<128x1xf32>
    %81 = arith.addf %77, %80 : vector<128x1xf32>
    %82 = math.rsqrt %81 : vector<128x1xf32>
    %83 = vector.broadcast %82 : vector<128x1xf32> to vector<128x32xf32>
    %84 = arith.mulf %79, %83 : vector<128x32xf32>
    %85 = vector.broadcast %15 : vector<1x32xf32> to vector<128x32xf32>
    %86 = arith.mulf %84, %85 : vector<128x32xf32>
    %87 = vector.broadcast %16 : vector<1x32xf32> to vector<128x32xf32>
    %88 = arith.addf %86, %87 : vector<128x32xf32>
    %89 = arith.addf %55, %88 : vector<128x32xf32>
    %90 = arith.truncf %89 : vector<128x32xf32> to vector<128x32xbf16>
    %cst_44 = arith.constant dense<0.000000e+00> : vector<128x16xf32>
    %91 = tpu.matmul %90, %6, %cst_44 {dimension_numbers = #tpu.dot_dimension_numbers<[1], [0], [0], [1], [0, 0, 1, 1], [], []>} : vector<128x32xbf16>, vector<32x16xbf16>, vector<128x16xf32> -> vector<128x16xf32>
    %92 = vector.broadcast %17 : vector<1x16xf32> to vector<128x16xf32>
    %93 = arith.addf %91, %92 : vector<128x16xf32>
    %94 = math.tanh %93 : vector<128x16xf32>
    %95 = arith.truncf %94 : vector<128x16xf32> to vector<128x16xbf16>
    %cst_45 = arith.constant dense<0.000000e+00> : vector<128x4xf32>
    %96 = tpu.matmul %95, %9, %cst_45 {dimension_numbers = #tpu.dot_dimension_numbers<[1], [0], [0], [1], [0, 0, 1, 1], [], []>} : vector<128x16xbf16>, vector<16x4xbf16>, vector<128x4xf32> -> vector<128x4xf32>
    %97 = vector.broadcast %18 : vector<1x4xf32> to vector<128x4xf32>
    %98 = arith.addf %96, %97 : vector<128x4xf32>
    %99 = vector.shape_cast %98 : vector<128x4xf32> to vector<8x16x4xf32>
    %cst_46 = arith.constant dense<0xFF800000> : vector<8x4xf32>
    %100 = vector.multi_reduction <maximumf>, %99, %cst_46 [1] : vector<8x16x4xf32> to vector<8x4xf32>
    %101 = vector.shape_cast %100 : vector<8x4xf32> to vector<8x1x4xf32>
    %102 = vector.broadcast %101 : vector<8x1x4xf32> to vector<8x16x4xf32>
    %103 = arith.subf %99, %102 : vector<8x16x4xf32>
    %104 = math.exp %103 : vector<8x16x4xf32>
    %cst_47 = arith.constant dense<0.000000e+00> : vector<8x4xf32>
    %105 = vector.multi_reduction <add>, %104, %cst_47 [1] : vector<8x16x4xf32> to vector<8x4xf32>
    %106 = vector.shape_cast %105 : vector<8x4xf32> to vector<8x1x4xf32>
    %107 = tpu.reciprocal %106 {approx = true} : vector<8x1x4xf32> -> vector<8x1x4xf32>
    %108 = vector.broadcast %107 : vector<8x1x4xf32> to vector<8x16x4xf32>
    %109 = arith.mulf %104, %108 : vector<8x16x4xf32>
    %cst_48 = arith.constant dense<0.000000e+00> : vector<8x16xf32>
    %110 = vector.multi_reduction <add>, %109, %cst_48 [2] : vector<8x16x4xf32> to vector<8x16xf32>
    %111 = vector.shape_cast %110 : vector<8x16xf32> to vector<8x16x1xf32>
    %cst_49 = arith.constant 4.000000e+00 : f32
    %112 = vector.broadcast %cst_49 : f32 to vector<8x16x1xf32>
    %113 = arith.divf %111, %112 : vector<8x16x1xf32>
    %114 = vector.shape_cast %113 : vector<8x16x1xf32> to vector<128x1xf32>
    %115 = vector.broadcast %114 : vector<128x1xf32> to vector<128x32xf32>
    %116 = arith.mulf %115, %89 : vector<128x32xf32>
    %117 = arith.truncf %116 : vector<128x32xf32> to vector<128x32xbf16>
    %cst_50 = arith.constant dense<0.000000e+00> : vector<8x32xf32>
    %118 = tpu.matmul %3, %117, %cst_50 {dimension_numbers = #tpu.dot_dimension_numbers<[1], [0], [0], [1], [0, 0, 1, 1], [], []>} : vector<8x128xbf16>, vector<128x32xbf16>, vector<8x32xf32> -> vector<8x32xf32>
    %119 = arith.truncf %118 : vector<8x32xf32> to vector<8x32xbf16>
    %cst_51 = arith.constant dense<0.000000e+00> : vector<8x4xf32>
    %120 = tpu.matmul %119, %7, %cst_51 {dimension_numbers = #tpu.dot_dimension_numbers<[1], [0], [0], [1], [0, 0, 1, 1], [], []>} : vector<8x32xbf16>, vector<32x4xbf16>, vector<8x4xf32> -> vector<8x4xf32>
    %121 = vector.broadcast %19 : vector<1x4xf32> to vector<8x4xf32>
    %122 = arith.addf %120, %121 : vector<8x4xf32>
    %c0_52 = arith.constant 0 : index
    %c0_53 = arith.constant 0 : index
    %c0_54 = arith.constant 0 : index
    %123 = vector.load %arg8[%c0_52, %c0_53, %c0_54] : memref<1x8x4xf32, #tpu.memory_space<vmem>>, vector<1x8x4xf32>
    %124 = vector.shape_cast %123 : vector<1x8x4xf32> to vector<8x4xf32>
    %125 = vector.shape_cast %122 : vector<8x4xf32> to vector<1x8x4xf32>
    tpu.vector_store %arg8[%c0_52, %c0_53, %c0_54], %125 {strides = array<i32>} : memref<1x8x4xf32, #tpu.memory_space<vmem>>, vector<1x8x4xf32>,
    %c0_55 = arith.constant 0 : index
    %c0_56 = arith.constant 0 : index
    %126 = vector.load %arg9[%c0_55, %c0_56] : memref<128x64xf32, #tpu.memory_space<vmem>>, vector<128x32xf32>
    tpu.vector_store %arg9[%c0_55, %c0_56], %22 {strides = array<i32>} : memref<128x64xf32, #tpu.memory_space<vmem>>, vector<128x32xf32>,
    %c0_57 = arith.constant 0 : index
    %c32_58 = arith.constant 32 : index
    %127 = vector.load %arg9[%c0_57, %c32_58] : memref<128x64xf32, #tpu.memory_space<vmem>>, vector<128x32xf32>
    tpu.vector_store %arg9[%c0_57, %c32_58], %89 {strides = array<i32>} : memref<128x64xf32, #tpu.memory_space<vmem>>, vector<128x32xf32>,
    return
  }
  func.func @transform_0(%arg0: i32) -> (i32, i32) {
    %c0_i32 = arith.constant 0 : i32
    %c0_i32_0 = arith.constant 0 : i32
    return %arg0, %c0_i32 : i32, i32
  }
  func.func @transform_1(%arg0: i32) -> (i32, i32, i32) {
    %c0_i32 = arith.constant 0 : i32
    %c0_i32_0 = arith.constant 0 : i32
    %c0_i32_1 = arith.constant 0 : i32
    return %arg0, %c0_i32, %c0_i32_0 : i32, i32, i32
  }
  func.func @transform_2(%arg0: i32) -> (i32, i32) {
    %c0_i32 = arith.constant 0 : i32
    %c0_i32_0 = arith.constant 0 : i32
    %c0_i32_1 = arith.constant 0 : i32
    return %c0_i32, %c0_i32_0 : i32, i32
  }
  func.func @transform_3(%arg0: i32) -> (i32, i32) {
    %c0_i32 = arith.constant 0 : i32
    %c0_i32_0 = arith.constant 0 : i32
    %c0_i32_1 = arith.constant 0 : i32
    return %c0_i32, %c0_i32_0 : i32, i32
  }
  func.func @transform_4(%arg0: i32) -> (i32, i32) {
    %c0_i32 = arith.constant 0 : i32
    %c0_i32_0 = arith.constant 0 : i32
    %c0_i32_1 = arith.constant 0 : i32
    return %c0_i32, %c0_i32_0 : i32, i32
  }
  func.func @transform_5(%arg0: i32) -> (i32, i32) {
    %c0_i32 = arith.constant 0 : i32
    %c0_i32_0 = arith.constant 0 : i32
    %c0_i32_1 = arith.constant 0 : i32
    return %c0_i32, %c0_i32_0 : i32, i32
  }
  func.func @transform_6(%arg0: i32) -> (i32, i32) {
    %c0_i32 = arith.constant 0 : i32
    %c0_i32_0 = arith.constant 0 : i32
    %c0_i32_1 = arith.constant 0 : i32
    return %c0_i32, %c0_i32_0 : i32, i32
  }
  func.func @transform_7(%arg0: i32) -> (i32, i32, i32) {
    %c0_i32 = arith.constant 0 : i32
    %c0_i32_0 = arith.constant 0 : i32
    %c0_i32_1 = arith.constant 0 : i32
    return %arg0, %c0_i32, %c0_i32_0 : i32, i32, i32
  }
  func.func @transform_8(%arg0: i32) -> (i32, i32) {
    %c0_i32 = arith.constant 0 : i32
    %c0_i32_0 = arith.constant 0 : i32
    return %arg0, %c0_i32 : i32, i32
  }
}

</mosaic_0001>

<bundles_post_ra>
// kernel: graph_model_forward.1
= control target key start
LH: loop header
LB: loop body
LE: loop exit
PB: predicated region body
PF: predicated region fallthrough
CT: control target
= control target key end

     0   :  { %vm148_vm0 = vcmask 1043456   ;;  %vm123_vm1 = vcmask 64512   ;;  %vm426_vm2 = vcmask 261120   ;;  %s2726_s28 = smov 96   ;;  %s2727_s14 = smov 64   ;;  %s3909_s4 = inlined_call_operand.vmem [shape: bf16[8,32], index: 4, kind: input, shape index: {}]   ;;  %s3910_s0 = inlined_call_operand.vmem [shape: bf16[128,8], index: 0, kind: input, shape index: {}]   ;;  %s3911_s1 = inlined_call_operand.vmem [shape: bf16[1,128,128], index: 1, kind: input, shape index: {}]   ;;  %s3912_s3 = inlined_call_operand.vmem [shape: bf16[32,84], index: 3, kind: input, shape index: {}]   ;;  %s3913_s6 = inlined_call_operand.vmem [shape: f32[16,32], index: 6, kind: input, shape index: {}]   ;;  %s3914_s8 = inlined_call_operand.vmem [shape: f32[128,64], index: 8, kind: output, shape index: {1}]   ;;  %s3915_s5 = inlined_call_operand.vmem [shape: bf16[16,4], index: 5, kind: input, shape index: {}]   ;;  %s3916_s2 = inlined_call_operand.vmem [shape: bf16[8,128], index: 2, kind: input, shape index: {}]   ;;  %s3917_s7 = inlined_call_operand.vmem [shape: f32[1,8,4], index: 7, kind: output, shape index: {0}]  }
   0x1   :  { %v66_v0 = vld [vmem:[%s3909_s4] sm:$0xf]  ;;  %v2560_v3 = vld [vmem:[%s3910_s0 + $0x8] sm:$0xff]   ;;  %v2561_v4 = vld [vmem:[%s3910_s0 + $0x10] sm:$0xff]   ;;  %s2730_s27 = smov 32  }
   0x2   :  { %2552 = vmatprep.subr.msk.bf16.mxu0 %vm148_vm0, %v66_v0  ;;  %v150_v1 = vsel %vm148_vm0, %v66_v0, 0  ;;  %v2559_v2 = vld [vmem:[%s3910_s0] sm:$0xff]   ;;  %v2562_v5 = vld [vmem:[%s3910_s0 + $0x18] sm:$0xff]   ;;  %v2564_v7 = vld [vmem:[%s3910_s0 + $0x28] sm:$0xff]  }
   0x3   :  { %2365 = vmatpush3.bf16.msra.mxu0 %v150_v1  ;;  %2366 = vmatprep.mubr.msk.bf16.mxu0 %vm123_vm1, %v2559_v2  ;;  %v2563_v6 = vld [vmem:[%s3910_s0 + $0x20] sm:$0xff]   ;;  %v2565_v8 = vld [vmem:[%s3910_s0 + $0x30] sm:$0xff]   ;;  %v2566_v9 = vld [vmem:[%s3910_s0 + $0x38] sm:$0xff]  }
   0x4   :  { %v2815_v10 = vld [vmem:[%s3911_s1] sm:$0xff]   ;;  %v2913_v53 = vld [vmem:[%s3911_s1 + $0x8] sm:$0xff]   ;;  %v2918_v54 = vld [vmem:[%s3911_s1 + $0x10] sm:$0xff]  }
   0x5   :  { %2398 = vmatprep.mubr.bf16.mxu1 %v2815_v10  ;;  %v2821_v11 = vld [vmem:[%s3912_s3] sm:$0xff]   ;;  %v2925_v55 = vld [vmem:[%s3911_s1 + $0x18] sm:$0xff]   ;;  %v2937_v57 = vld [vmem:[%s3911_s1 + $0x28] sm:$0xff]  }
   0x6   :  { %2367 = vmatmul.mubr.msk.bf16.vlgmr.msra.gmra.mrb[0].mxu0 %vm123_vm1, %v2560_v3  ;;  %2414 = vmatprep.subr.bf16.mxu0 %v2821_v11  ;;  %v2828_v12 = vld [vmem:[%s3913_s6] ss:$0 sm:$0xff]  ;;  %v2942_v58 = vld [vmem:[%s3911_s1 + $0x30] sm:$0xff]   ;;  %v2949_v59 = vld [vmem:[%s3911_s1 + $0x38] sm:$0xff]  }
   0x7   :  { %2370 = vmatprep.mubr.msk.bf16.mxu0 %vm123_vm1, %v2561_v4  ;;  %2415 = vmatpush3.bf16.msra.mxu0 %v2821_v11  ;;  %v2930_v56 = vld [vmem:[%s3911_s1 + $0x20] sm:$0xff]   ;;  %v2956_v60 = vld [vmem:[%s3912_s3 + $0x8] sm:$0xff]   ;;  %s2729_s1 = smov 48  }
   0x8   :  { %2416 = vmatprep.subr.bf16.mxu0 %v2956_v60 }
   0xb   :  { %2417 = vmatpush3.bf16.msra.mxu0 %v2956_v60 }
   0xe   :  { %2371 = vmatmul.mubr.msk.bf16.gmra.mrb[4].mxu0 %vm123_vm1, %v2562_v5 }
   0xf   :  { %2374 = vmatprep.mubr.msk.bf16.mxu0 %vm123_vm1, %v2563_v6 }
  0x16   :  { %2375 = vmatmul.mubr.msk.bf16.gmra.mrb[8].mxu0 %vm123_vm1, %v2564_v7 }
  0x17   :  { %2378 = vmatprep.mubr.msk.bf16.mxu0 %vm123_vm1, %v2565_v8 }
  0x1e   :  { %2379 = vmatmul.mubr.msk.bf16.gmra.mrb[12].mxu0 %vm123_vm1, %v2566_v9 }
  0xd9   :  { %v2368_v13 = vpop.f32.mrb[0].mxu0 }
  0xda   :  { %v195_v14 = vadd.f32 %v2368_v13, %v2828_v12  ;;  %v186_v15 = vpop.f32.mrb[1].mxu0 }
  0xdb   :  { %v187_v16 = vadd.f32 %v2828_v12, %v186_v15  ;;  %v2369_v17 = vpop.f32.mrb[2].mxu0 }
  0xdc   :  { %2099 = vst.msk [vmem:[%s3914_s8 + $0x10] sm:$0xff] %vm426_vm2, %v195_v14  ;;  %v198_v18 = vadd.f32 %v2369_v17, %v2828_v12  ;;  %v189_v19 = vpop.f32.mrb[3].mxu0 }
  0xdd   :  { %2097 = vst.msk [vmem:[%s3914_s8] sm:$0xff] %vm426_vm2, %v187_v16  ;;  %v190_v20 = vadd.f32 %v2828_v12, %v189_v19 }
  0xde   :  { %v250_v21 = vpack.c.bf16 %v198_v18, %v195_v14  ;;  %2100 = vst.msk [vmem:[%s3914_s8 + $0x18] sm:$0xff] %vm426_vm2, %v198_v18 }
  0xdf   :  { %2098 = vst.msk [vmem:[%s3914_s8 + $0x8] sm:$0xff] %vm426_vm2, %v190_v20  ;;  %v249_v22 = vpack.c.bf16 %v190_v20, %v187_v16 }
  0xe1   :  { %v2372_v23 = vpop.f32.mrb[4].mxu0  ;;  %2382 = vmatprep.subr.bf16.mxu1 %v249_v22 }
  0xe2   :  { %v211_v24 = vadd.f32 %v2372_v23, %v2828_v12  ;;  %v202_v25 = vpop.f32.mrb[5].mxu0  ;;  %2383 = vmatpush3.bf16.msra.mxu1 %v249_v22  ;;  %v2971_v22 = vld [vmem:[%s3913_s6 + $0x1] ss:$0 sm:$0xff] }
  0xe3   :  { %v203_v26 = vadd.f32 %v2828_v12, %v202_v25  ;;  %v2373_v27 = vpop.f32.mrb[6].mxu0  ;;  %2384 = vmatprep.subr.bf16.mxu1 %v250_v21 }
  0xe4   :  { %2103 = vst.msk [vmem:[%s3914_s8 + $0x30] sm:$0xff] %vm426_vm2, %v211_v24  ;;  %v214_v28 = vadd.f32 %v2373_v27, %v2828_v12  ;;  %v205_v29 = vpop.f32.mrb[7].mxu0 }
  0xe5   :  { %2101 = vst.msk [vmem:[%s3914_s8 + $0x20] sm:$0xff] %vm426_vm2, %v203_v26  ;;  %v206_v30 = vadd.f32 %v2828_v12, %v205_v29 }
  0xe6   :  { %v252_v31 = vpack.c.bf16 %v214_v28, %v211_v24  ;;  %2104 = vst.msk [vmem:[%s3914_s8 + $0x38] sm:$0xff] %vm426_vm2, %v214_v28  ;;  %2385 = vmatpush3.bf16.msra.mxu1 %v250_v21 }
  0xe7   :  { %v251_v32 = vpack.c.bf16 %v206_v30, %v203_v26  ;;  %2102 = vst.msk [vmem:[%s3914_s8 + $0x28] sm:$0xff] %vm426_vm2, %v206_v30 }
  0xe9   :  { %v2376_v33 = vpop.f32.mrb[8].mxu0  ;;  %2386 = vmatprep.subr.bf16.mxu1 %v251_v32 }
  0xea   :  { %v227_v34 = vadd.f32 %v2376_v33, %v2828_v12  ;;  %v218_v35 = vpop.f32.mrb[9].mxu0  ;;  %2387 = vmatpush3.bf16.msra.mxu1 %v251_v32 }
  0xeb   :  { %v219_v36 = vadd.f32 %v2828_v12, %v218_v35  ;;  %v2377_v37 = vpop.f32.mrb[10].mxu0  ;;  %2388 = vmatprep.subr.bf16.mxu1 %v252_v31 }
  0xec   :  { %2107 = vst.msk [vmem:[%s3914_s8 + $0x50] sm:$0xff] %vm426_vm2, %v227_v34  ;;  %v230_v38 = vadd.f32 %v2377_v37, %v2828_v12  ;;  %v221_v39 = vpop.f32.mrb[11].mxu0 }
  0xed   :  { %2105 = vst.msk [vmem:[%s3914_s8 + $0x40] sm:$0xff] %vm426_vm2, %v219_v36  ;;  %v222_v40 = vadd.f32 %v2828_v12, %v221_v39 }
  0xee   :  { %v254_v41 = vpack.c.bf16 %v230_v38, %v227_v34  ;;  %2108 = vst.msk [vmem:[%s3914_s8 + $0x58] sm:$0xff] %vm426_vm2, %v230_v38  ;;  %2389 = vmatpush3.bf16.msra.mxu1 %v252_v31 }
  0xef   :  { %v253_v42 = vpack.c.bf16 %v222_v40, %v219_v36  ;;  %2106 = vst.msk [vmem:[%s3914_s8 + $0x48] sm:$0xff] %vm426_vm2, %v222_v40 }
  0xf1   :  { %v2380_v43 = vpop.f32.mrb[12].mxu0  ;;  %2390 = vmatprep.subr.bf16.mxu1 %v253_v42 }
  0xf2   :  { %v243_v44 = vadd.f32 %v2380_v43, %v2828_v12  ;;  %v234_v45 = vpop.f32.mrb[13].mxu0  ;;  %2391 = vmatpush3.bf16.msra.mxu1 %v253_v42 }
  0xf3   :  { %v235_v46 = vadd.f32 %v2828_v12, %v234_v45  ;;  %v2381_v47 = vpop.f32.mrb[14].mxu0  ;;  %2392 = vmatprep.subr.bf16.mxu1 %v254_v41 }
  0xf4   :  { %2111 = vst.msk [vmem:[%s3914_s8 + $0x70] sm:$0xff] %vm426_vm2, %v243_v44  ;;  %v246_v48 = vadd.f32 %v2381_v47, %v2828_v12  ;;  %v237_v49 = vpop.f32.mrb[15].mxu0 }
  0xf5   :  { %2109 = vst.msk [vmem:[%s3914_s8 + $0x60] sm:$0xff] %vm426_vm2, %v235_v46  ;;  %v238_v50 = vadd.f32 %v2828_v12, %v237_v49 }
  0xf6   :  { %v256_v51 = vpack.c.bf16 %v246_v48, %v243_v44  ;;  %2112 = vst.msk [vmem:[%s3914_s8 + $0x78] sm:$0xff] %vm426_vm2, %v246_v48  ;;  %2393 = vmatpush3.bf16.msra.mxu1 %v254_v41 }
  0xf7   :  { %v255_v52 = vpack.c.bf16 %v238_v50, %v235_v46  ;;  %2110 = vst.msk [vmem:[%s3914_s8 + $0x68] sm:$0xff] %vm426_vm2, %v238_v50 }
  0xf9   :  { %2394 = vmatprep.subr.bf16.mxu1 %v255_v52 }
  0xfa   :  { %2395 = vmatpush3.bf16.msra.mxu1 %v255_v52 }
  0xfb   :  { %2396 = vmatprep.subr.bf16.mxu1 %v256_v51 }
  0xfe   :  { %2397 = vmatpush3.bf16.msra.mxu1 %v256_v51 }
 0x101   :  { %2399 = vmatmul.mubr.bf16.vlgmr.msra.gmra.mrb[0].mxu1 %v2913_v53 }
 0x102   :  { %2402 = vmatprep.mubr.bf16.mxu1 %v2918_v54 }
 0x109   :  { %2403 = vmatmul.mubr.bf16.gmra.mrb[4].mxu1 %v2925_v55 }
 0x10a   :  { %2406 = vmatprep.mubr.bf16.mxu1 %v2930_v56 }
 0x111   :  { %2407 = vmatmul.mubr.bf16.gmra.mrb[8].mxu1 %v2937_v57 }
 0x112   :  { %2410 = vmatprep.mubr.bf16.mxu1 %v2942_v58 }
 0x119   :  { %2411 = vmatmul.mubr.bf16.gmra.mrb[12].mxu1 %v2949_v59 }
 0x11a   :  { %2450 = vmatprep.mubr.bf16.mxu1 %v2815_v10 }
 0x1d4   :  { %v2400_v61 = vpop.f32.mrb[0].mxu1 }
 0x1d5   :  { %v339_v62 = vpop.f32.mrb[1].mxu1 }
 0x1d6   :  { %v2401_v63 = vpop.f32.mrb[2].mxu1 }
 0x1d7   :  { %v403_v0 = vpack.c.bf16 %v2401_v63, %v2400_v61  ;;  %v342_v1 = vpop.f32.mrb[3].mxu1 }
 0x1d8   :  { %v402_v2 = vpack.c.bf16 %v342_v1, %v339_v62 }
 0x1da   :  { %2418 = vmatprep.mubr.msk.bf16.mxu0 %vm426_vm2, %v402_v2 }
 0x1db   :  { %2419 = vmatmul.mubr.msk.bf16.vlgmr.msra.gmra.mrb[16].mxu0 %vm426_vm2, %v403_v0 }
 0x1dc   :  { %v2404_v3 = vpop.f32.mrb[4].mxu1 }
 0x1dd   :  { %v355_v4 = vpop.f32.mrb[5].mxu1 }
 0x1de   :  { %v2405_v5 = vpop.f32.mrb[6].mxu1 }
 0x1df   :  { %v405_v6 = vpack.c.bf16 %v2405_v5, %v2404_v3  ;;  %v358_v7 = vpop.f32.mrb[7].mxu1 }
 0x1e0   :  { %v404_v8 = vpack.c.bf16 %v358_v7, %v355_v4 }
 0x1e2   :  { %2422 = vmatprep.mubr.msk.bf16.mxu0 %vm426_vm2, %v404_v8 }
 0x1e3   :  { %2423 = vmatmul.mubr.msk.bf16.gmra.mrb[20].mxu0 %vm426_vm2, %v405_v6 }
 0x1e4   :  { %v2408_v9 = vpop.f32.mrb[8].mxu1 }
 0x1e5   :  { %v371_v10 = vpop.f32.mrb[9].mxu1 }
 0x1e6   :  { %v2409_v12 = vpop.f32.mrb[10].mxu1 }
 0x1e7   :  { %v407_v13 = vpack.c.bf16 %v2409_v12, %v2408_v9  ;;  %v374_v14 = vpop.f32.mrb[11].mxu1 }
 0x1e8   :  { %v406_v15 = vpack.c.bf16 %v374_v14, %v371_v10 }
 0x1ea   :  { %2426 = vmatprep.mubr.msk.bf16.mxu0 %vm426_vm2, %v406_v15 }
 0x1eb   :  { %2427 = vmatmul.mubr.msk.bf16.gmra.mrb[24].mxu0 %vm426_vm2, %v407_v13 }
 0x1ec   :  { %v2412_v16 = vpop.f32.mrb[12].mxu1 }
 0x1ed   :  { %v387_v17 = vpop.f32.mrb[13].mxu1 }
 0x1ee   :  { %v2413_v18 = vpop.f32.mrb[14].mxu1 }
 0x1ef   :  { %v409_v19 = vpack.c.bf16 %v2413_v18, %v2412_v16  ;;  %v390_v20 = vpop.f32.mrb[15].mxu1 }
 0x1f0   :  { %v408_v21 = vpack.c.bf16 %v390_v20, %v387_v17 }
 0x1f2   :  { %2430 = vmatprep.mubr.msk.bf16.mxu0 %vm426_vm2, %v408_v21 }
 0x1f3   :  { %2431 = vmatmul.mubr.msk.bf16.gmra.mrb[28].mxu0 %vm426_vm2, %v409_v19 }
 0x2ae   :  { %v2420_v23 = vpop.f32.mrb[16].mxu0 }
 0x2af   :  { %v494_v24 = vadd.f32 %v2420_v23, %v2971_v22  ;;  %v485_v25 = vpop.f32.mrb[17].mxu0 }
 0x2b0   :  { %v486_v26 = vadd.f32 %v2971_v22, %v485_v25  ;;  %v2421_v27 = vpop.f32.mrb[18].mxu0 }
 0x2b1   :  { %v566_v28 = vmul.f32 0.1, %v494_v24  ;;  %v497_v29 = vadd.f32 %v2421_v27, %v2971_v22  ;;  %v488_v30 = vpop.f32.mrb[19].mxu0  ;;  %vm550_vm3 = vcmp.ge.f32.partialorder %v494_v24, 0.0 }
 0x2b2   :  { %v564_v31 = vmul.f32 0.1, %v486_v26  ;;  %v489_v32 = vadd.f32 %v2971_v22, %v488_v30  ;;  %vm548_vm4 = vcmp.ge.f32.partialorder %v486_v26, 0.0 }
 0x2b3   :  { %v567_v33 = vmul.f32 0.1, %v497_v29  ;;  %v2977_v34 = vsel %vm550_vm3, %v494_v24, %v566_v28  ;;  %vm551_vm5 = vcmp.ge.f32.partialorder %v497_v29, 0.0 }
 0x2b4   :  { %v565_v35 = vmul.f32 0.1, %v489_v32  ;;  %v602_v36 = vsel %vm426_vm2, %v2977_v34, 0.0  ;;  %v2981_v37 = vsel %vm548_vm4, %v486_v26, %v564_v31  ;;  %vm549_vm6 = vcmp.ge.f32.partialorder %v489_v32, 0.0 }
 0x2b5   :  { %603 = vadd.xlane.f32.xlu1 %v602_v36  ;;  %v596_v38 = vsel %vm426_vm2, %v2981_v37, 0.0  ;;  %v2985_v39 = vsel %vm551_vm5, %v497_v29, %v567_v33 }
 0x2b6   :  { %597 = vadd.xlane.f32.xlu0 %v596_v38  ;;  %v2424_v40 = vpop.f32.mrb[20].mxu0  ;;  %v2987_v41 = vsel %vm549_vm6, %v489_v32, %v565_v35  ;;  %v605_v46 = vsel %vm426_vm2, %v2985_v39, 0.0 }
 0x2b7   :  { %v510_v42 = vadd.f32 %v2424_v40, %v2971_v22  ;;  %v501_v43 = vpop.f32.mrb[21].mxu0  ;;  %v599_v49 = vsel %vm426_vm2, %v2987_v41, 0.0 }
 0x2b8   :  { %v502_v44 = vadd.f32 %v2971_v22, %v501_v43  ;;  %v2425_v45 = vpop.f32.mrb[22].mxu0 }
 0x2b9   :  { %v513_v47 = vadd.f32 %v2425_v45, %v2971_v22  ;;  %606 = vadd.xlane.f32.xlu1 %v605_v46  ;;  %v504_v48 = vpop.f32.mrb[23].mxu0  ;;  %v570_v50 = vmul.f32 0.1, %v510_v42  ;;  %vm554_vm8 = vcmp.ge.f32.partialorder %v510_v42, 0.0 }
 0x2ba   :  { %v568_v51 = vmul.f32 0.1, %v502_v44  ;;  %v505_v52 = vadd.f32 %v2971_v22, %v504_v48  ;;  %600 = vadd.xlane.f32.xlu0 %v599_v49  ;;  %vm552_vm7 = vcmp.ge.f32.partialorder %v502_v44, 0.0 }
 0x2bb   :  { %v571_v61 = vmul.f32 0.1, %v513_v47  ;;  %vm555_vm10 = vcmp.ge.f32.partialorder %v513_v47, 0.0  ;;  %v3003_v3 = vsel %vm554_vm8, %v510_v42, %v570_v50 }
 0x2bc   :  { %v569_v62 = vmul.f32 0.1, %v505_v52  ;;  %v2997_v63 = vsel %vm552_vm7, %v502_v44, %v568_v51  ;;  %vm553_vm9 = vcmp.ge.f32.partialorder %v505_v52, 0.0  ;;  %v614_v13 = vsel %vm426_vm2, %v3003_v3, 0.0 }
 0x2bd   :  { %v608_v0 = vsel %vm426_vm2, %v2997_v63, 0.0  ;;  %v3009_v9 = vsel %vm555_vm10, %v513_v47, %v571_v61 }
 0x2be   :  { %609 = vadd.xlane.f32.xlu0 %v608_v0  ;;  %v2428_v1 = vpop.f32.mrb[24].mxu0  ;;  %v3001_v2 = vsel %vm553_vm9, %v505_v52, %v569_v62  ;;  %v617_v17 = vsel %vm426_vm2, %v3009_v9, 0.0 }
 0x2bf   :  { %v526_v4 = vadd.f32 %v2428_v1, %v2971_v22  ;;  %v517_v5 = vpop.f32.mrb[25].mxu0  ;;  %v611_v6 = vsel %vm426_vm2, %v3001_v2, 0.0 }
 0x2c0   :  { %v518_v7 = vadd.f32 %v2971_v22, %v517_v5  ;;  %612 = vadd.xlane.f32.xlu1 %v611_v6  ;;  %v2429_v8 = vpop.f32.mrb[26].mxu0 }
 0x2c1   :  { %v529_v10 = vadd.f32 %v2429_v8, %v2971_v22  ;;  %v520_v12 = vpop.f32.mrb[27].mxu0  ;;  %v574_v14 = vmul.f32 0.1, %v526_v4  ;;  %vm558_vm12 = vcmp.ge.f32.partialorder %v526_v4, 0.0 }
 0x2c2   :  { %v572_v15 = vmul.f32 0.1, %v518_v7  ;;  %v521_v16 = vadd.f32 %v2971_v22, %v520_v12  ;;  %615 = vadd.xlane.f32.xlu0 %v614_v13  ;;  %vm556_vm11 = vcmp.ge.f32.partialorder %v518_v7, 0.0 }
 0x2c3   :  { %v575_v18 = vmul.f32 0.1, %v529_v10  ;;  %vm559_vm14 = vcmp.ge.f32.partialorder %v529_v10, 0.0  ;;  %v3023_v25 = vsel %vm558_vm12, %v526_v4, %v574_v14 }
 0x2c4   :  { %v573_v19 = vmul.f32 0.1, %v521_v16  ;;  %618 = vadd.xlane.f32.xlu1 %v617_v17  ;;  %v3017_v20 = vsel %vm556_vm11, %v518_v7, %v572_v15  ;;  %vm557_vm13 = vcmp.ge.f32.partialorder %v521_v16, 0.0  ;;  %v626_v35 = vsel %vm426_vm2, %v3023_v25, 0.0 }
 0x2c5   :  { %v620_v21 = vsel %vm426_vm2, %v3017_v20, 0.0  ;;  %v3029_v31 = vsel %vm559_vm14, %v529_v10, %v575_v18 }
 0x2c6   :  { %621 = vadd.xlane.f32.xlu0 %v620_v21  ;;  %v2432_v23 = vpop.f32.mrb[28].mxu0  ;;  %v3021_v24 = vsel %vm557_vm13, %v521_v16, %v573_v19  ;;  %v629_v42 = vsel %vm426_vm2, %v3029_v31, 0.0 }
 0x2c7   :  { %v542_v26 = vadd.f32 %v2432_v23, %v2971_v22  ;;  %v533_v27 = vpop.f32.mrb[29].mxu0  ;;  %v623_v28 = vsel %vm426_vm2, %v3021_v24, 0.0 }
 0x2c8   :  { %v534_v29 = vadd.f32 %v2971_v22, %v533_v27  ;;  %624 = vadd.xlane.f32.xlu1 %v623_v28  ;;  %v2433_v30 = vpop.f32.mrb[30].mxu0 }
 0x2c9   :  { %v545_v32 = vadd.f32 %v2433_v30, %v2971_v22  ;;  %v536_v33 = vpop.f32.mrb[31].mxu0  ;;  %v578_v36 = vmul.f32 0.1, %v542_v26  ;;  %vm562_vm0 = vcmp.ge.f32.partialorder %v542_v26, 0.0 }
 0x2ca   :  { %v576_v38 = vmul.f32 0.1, %v534_v29  ;;  %v537_v40 = vadd.f32 %v2971_v22, %v536_v33  ;;  %627 = vadd.xlane.f32.xlu0 %v626_v35  ;;  %vm560_vm15 = vcmp.ge.f32.partialorder %v534_v29, 0.0 }
 0x2cb   :  { %v579_v43 = vmul.f32 0.1, %v545_v32  ;;  %vm563_vm3 = vcmp.ge.f32.partialorder %v545_v32, 0.0  ;;  %v3043_v22 = vsel %vm562_vm0, %v542_v26, %v578_v36 }
 0x2cc   :  { %v577_v44 = vmul.f32 0.1, %v537_v40  ;;  %630 = vadd.xlane.f32.xlu1 %v629_v42  ;;  %v3037_v45 = vsel %vm560_vm15, %v534_v29, %v576_v38  ;;  %vm561_vm1 = vcmp.ge.f32.partialorder %v537_v40, 0.0  ;;  %v638_v50 = vsel %vm426_vm2, %v3043_v22, 0.0 }
 0x2cd   :  { %v632_v46 = vsel %vm426_vm2, %v3037_v45, 0.0  ;;  %v3047_v49 = vsel %vm563_vm3, %v545_v32, %v579_v43 }
 0x2ce   :  { %633 = vadd.xlane.f32.xlu0 %v632_v46  ;;  %v3041_v47 = vsel %vm561_vm1, %v537_v40, %v577_v44  ;;  %v641_v51 = vsel %vm426_vm2, %v3047_v49, 0.0 }
 0x2cf   :  { %v635_v48 = vsel %vm426_vm2, %v3041_v47, 0.0 }
 0x2d0   :  { %636 = vadd.xlane.f32.xlu1 %v635_v48 }
 0x2d2   :  { %639 = vadd.xlane.f32.xlu0 %v638_v50 }
 0x2d4   :  { %642 = vadd.xlane.f32.xlu1 %v641_v51 }
 0x342   :  { %v604_v52 = vpop.xlane.xlu1 %603 }
 0x343   :  { %v647_v61 = vmul.f32 0.03125, %v604_v52  ;;  %v598_v62 = vpop.xlane.xlu0 %597 }
 0x344   :  { %v645_v0 = vmul.f32 0.03125, %v598_v62 }
 0x345   :  { %v3054_v1 = vsub.f32 %v2977_v34, %v647_v61 }
 0x346   :  { %v3057_v4 = vsub.f32 %v2981_v37, %v645_v0  ;;  %v607_v5 = vpop.xlane.xlu1 %606 }
 0x347   :  { %v648_v6 = vmul.f32 0.03125, %v607_v5  ;;  %v601_v7 = vpop.xlane.xlu0 %600  ;;  %v679_v34 = vmul.f32 %v3054_v1, %v3054_v1 }
 0x348   :  { %v646_v8 = vmul.f32 0.03125, %v601_v7  ;;  %v677_v10 = vmul.f32 %v3057_v4, %v3057_v4 }
 0x349   :  { %v3062_v12 = vsub.f32 %v2985_v39, %v648_v6  ;;  %v699_v21 = vsel %vm426_vm2, %v679_v34, 0.0 }
 0x34a   :  { %v3065_v13 = vsub.f32 %v2987_v41, %v646_v8  ;;  %v693_v14 = vsel %vm426_vm2, %v677_v10, 0.0 }
 0x34b   :  { %v610_v37 = vpop.xlane.xlu0 %609  ;;  %694 = vadd.xlane.f32.xlu0 %v693_v14  ;;  %v680_v18 = vmul.f32 %v3062_v12, %v3062_v12 }
 0x34c   :  { %v649_v15 = vmul.f32 0.03125, %v610_v37  ;;  %v678_v16 = vmul.f32 %v3065_v13, %v3065_v13 }
 0x34d   :  { %v613_v17 = vpop.xlane.xlu1 %612  ;;  %v702_v30 = vsel %vm426_vm2, %v680_v18, 0.0 }
 0x34e   :  { %v3075_v39 = vsub.f32 %v2997_v63, %v649_v15  ;;  %v650_v41 = vmul.f32 0.03125, %v613_v17  ;;  %v696_v19 = vsel %vm426_vm2, %v678_v16, 0.0 }
 0x34f   :  { %v616_v23 = vpop.xlane.xlu0 %615  ;;  %697 = vadd.xlane.f32.xlu1 %v696_v19  ;;  %700 = vadd.xlane.f32.xlu0 %v699_v21 }
 0x350   :  { %v3080_v26 = vsub.f32 %v3001_v2, %v650_v41  ;;  %v651_v27 = vmul.f32 0.03125, %v616_v23  ;;  %v681_v28 = vmul.f32 %v3075_v39, %v3075_v39 }
 0x351   :  { %v619_v29 = vpop.xlane.xlu1 %618 }
 0x352   :  { %v3086_v63 = vsub.f32 %v3003_v3, %v651_v27  ;;  %v652_v32 = vmul.f32 0.03125, %v619_v29  ;;  %v705_v33 = vsel %vm426_vm2, %v681_v28, 0.0  ;;  %v682_v35 = vmul.f32 %v3080_v26, %v3080_v26 }
 0x353   :  { %v622_v36 = vpop.xlane.xlu0 %621  ;;  %703 = vadd.xlane.f32.xlu1 %v702_v30  ;;  %706 = vadd.xlane.f32.xlu0 %v705_v33 }
 0x354   :  { %v3092_v2 = vsub.f32 %v3009_v9, %v652_v32  ;;  %v653_v38 = vmul.f32 0.03125, %v622_v36  ;;  %v683_v40 = vmul.f32 %v3086_v63, %v3086_v63  ;;  %v708_v3 = vsel %vm426_vm2, %v682_v35, 0.0 }
 0x355   :  { %v625_v42 = vpop.xlane.xlu1 %624 }
 0x356   :  { %v3098_v43 = vsub.f32 %v3017_v20, %v653_v38  ;;  %v654_v44 = vmul.f32 0.03125, %v625_v42  ;;  %v711_v46 = vsel %vm426_vm2, %v683_v40, 0.0  ;;  %v684_v48 = vmul.f32 %v3092_v2, %v3092_v2 }
 0x357   :  { %v628_v50 = vpop.xlane.xlu0 %627  ;;  %709 = vadd.xlane.f32.xlu1 %v708_v3  ;;  %712 = vadd.xlane.f32.xlu0 %v711_v46 }
 0x358   :  { %v3104_v9 = vsub.f32 %v3021_v24, %v654_v44  ;;  %v655_v51 = vmul.f32 0.03125, %v628_v50  ;;  %v685_v52 = vmul.f32 %v3098_v43, %v3098_v43  ;;  %v714_v20 = vsel %vm426_vm2, %v684_v48, 0.0 }
 0x359   :  { %v631_v61 = vpop.xlane.xlu1 %630 }
 0x35a   :  { %v3110_v62 = vsub.f32 %v3023_v25, %v655_v51  ;;  %v656_v0 = vmul.f32 0.03125, %v631_v61  ;;  %v717_v5 = vsel %vm426_vm2, %v685_v52, 0.0  ;;  %v686_v6 = vmul.f32 %v3104_v9, %v3104_v9 }
 0x35b   :  { %715 = vadd.xlane.f32.xlu1 %v714_v20  ;;  %718 = vadd.xlane.f32.xlu0 %v717_v5  ;;  %v634_v24 = vpop.xlane.xlu0 %633 }
 0x35c   :  { %v3116_v7 = vsub.f32 %v3029_v31, %v656_v0  ;;  %v657_v8 = vmul.f32 0.03125, %v634_v24  ;;  %v687_v10 = vmul.f32 %v3110_v62, %v3110_v62  ;;  %v720_v25 = vsel %vm426_vm2, %v686_v6, 0.0 }
 0x35d   :  { %v637_v14 = vpop.xlane.xlu1 %636 }
 0x35e   :  { %v3122_v34 = vsub.f32 %v3037_v45, %v657_v8  ;;  %v658_v37 = vmul.f32 0.03125, %v637_v14  ;;  %v723_v15 = vsel %vm426_vm2, %v687_v10, 0.0  ;;  %v688_v16 = vmul.f32 %v3116_v7, %v3116_v7 }
 0x35f   :  { %721 = vadd.xlane.f32.xlu1 %v720_v25  ;;  %724 = vadd.xlane.f32.xlu0 %v723_v15  ;;  %v640_v31 = vpop.xlane.xlu0 %639 }
 0x360   :  { %v3128_v17 = vsub.f32 %v3041_v47, %v658_v37  ;;  %v659_v18 = vmul.f32 0.03125, %v640_v31  ;;  %v689_v41 = vmul.f32 %v3122_v34, %v3122_v34  ;;  %v726_v45 = vsel %vm426_vm2, %v688_v16, 0.0  ;;  %v3155_v16 = vld [vmem:[%s3913_s6 + $0x2] ss:$0 sm:$0xff] }
 0x361   :  { %v643_v19 = vpop.xlane.xlu1 %642 }
 0x362   :  { %v3134_v21 = vsub.f32 %v3043_v22, %v659_v18  ;;  %v660_v23 = vmul.f32 0.03125, %v643_v19  ;;  %v729_v27 = vsel %vm426_vm2, %v689_v41, 0.0  ;;  %v690_v28 = vmul.f32 %v3128_v17, %v3128_v17 }
 0x363   :  { %727 = vadd.xlane.f32.xlu1 %v726_v45  ;;  %730 = vadd.xlane.f32.xlu0 %v729_v27 }
 0x364   :  { %v3140_v47 = vsub.f32 %v3047_v49, %v660_v23  ;;  %v691_v29 = vmul.f32 %v3134_v21, %v3134_v21  ;;  %v732_v30 = vsel %vm426_vm2, %v690_v28, 0.0 }
 0x366   :  { %v735_v32 = vsel %vm426_vm2, %v691_v29, 0.0  ;;  %v692_v22 = vmul.f32 %v3140_v47, %v3140_v47 }
 0x367   :  { %733 = vadd.xlane.f32.xlu1 %v732_v30  ;;  %736 = vadd.xlane.f32.xlu0 %v735_v32  ;;  %v3162_v30 = vld [vmem:[%s3913_s6 + $0x3] ss:$0 sm:$0xff] }
 0x368   :  { %v738_v33 = vsel %vm426_vm2, %v692_v22, 0.0 }
 0x36b   :  { %739 = vadd.xlane.f32.xlu1 %v738_v33 }
 0x37c   :  { %964 = vrot.lane.b32.xlu1 %v2956_v60, %s2726_s28 }
 0x37d   :  { %962 = vrot.lane.b32.xlu0 %v2821_v11, %s2726_s28 }
 0x3d8   :  { %v695_v49 = vpop.xlane.xlu0 %694 }
 0x3d9   :  { %v741_v35 = vmul.f32 0.03125, %v695_v49 }
 0x3db   :  { %v757_v36 = vadd.f32 1e-05, %v741_v35 }
 0x3dc   :  { %v698_v38 = vpop.xlane.xlu1 %697  ;;  %v701_v40 = vpop.xlane.xlu0 %700 }
 0x3dd   :  { %2578 = vrsqrt.f32 %v757_v36  ;;  %v742_v42 = vmul.f32 0.03125, %v698_v38  ;;  %v743_v3 = vmul.f32 0.03125, %v701_v40 }
 0x3df   :  { %v758_v44 = vadd.f32 1e-05, %v742_v42  ;;  %v759_v46 = vadd.f32 1e-05, %v743_v3 }
 0x3e0   :  { %v704_v48 = vpop.xlane.xlu1 %703  ;;  %v707_v50 = vpop.xlane.xlu0 %706 }
 0x3e1   :  { %2580 = vrsqrt.f32 %v758_v44  ;;  %v744_v51 = vmul.f32 0.03125, %v704_v48  ;;  %v745_v52 = vmul.f32 0.03125, %v707_v50 }
 0x3e2   :  { %2582 = vrsqrt.f32 %v759_v46 }
 0x3e3   :  { %v760_v61 = vadd.f32 1e-05, %v744_v51  ;;  %v761_v11 = vadd.f32 1e-05, %v745_v52 }
 0x3e4   :  { %v710_v20 = vpop.xlane.xlu1 %709  ;;  %v713_v60 = vpop.xlane.xlu0 %712 }
 0x3e5   :  { %2584 = vrsqrt.f32 %v760_v61  ;;  %v746_v0 = vmul.f32 0.03125, %v710_v20  ;;  %v747_v5 = vmul.f32 0.03125, %v713_v60 }
 0x3e6   :  { %2586 = vrsqrt.f32 %v761_v11 }
 0x3e7   :  { %v2579_v6 = vpop.eup %2578  ;;  %v762_v24 = vadd.f32 1e-05, %v746_v0  ;;  %v763_v8 = vadd.f32 1e-05, %v747_v5 }
 0x3e8   :  { %v716_v10 = vpop.xlane.xlu1 %715  ;;  %v719_v14 = vpop.xlane.xlu0 %718  ;;  %v789_v25 = vmul.f32 %v2579_v6, %v3057_v4 }
 0x3e9   :  { %2588 = vrsqrt.f32 %v762_v24  ;;  %v748_v37 = vmul.f32 0.03125, %v716_v10  ;;  %v749_v15 = vmul.f32 0.03125, %v719_v14 }
 0x3ea   :  { %2590 = vrsqrt.f32 %v763_v8  ;;  %v809_v28 = vmul.f32 %v3155_v16, %v789_v25 }
 0x3eb   :  { %v2581_v31 = vpop.eup %2580  ;;  %v764_v18 = vadd.f32 1e-05, %v748_v37  ;;  %v765_v41 = vadd.f32 1e-05, %v749_v15 }
 0x3ec   :  { %v2583_v19 = vpop.eup %2582  ;;  %v722_v45 = vpop.xlane.xlu1 %721  ;;  %v790_v27 = vmul.f32 %v2581_v31, %v3065_v13  ;;  %v3167_v40 = vadd.f32 %v3162_v30, %v809_v28 }
 0x3ed   :  { %v725_v23 = vpop.xlane.xlu0 %724  ;;  %2592 = vrsqrt.f32 %v764_v18  ;;  %v750_v4 = vmul.f32 0.03125, %v722_v45  ;;  %v791_v32 = vmul.f32 %v2583_v19, %v3054_v1 }
 0x3ee   :  { %v751_v29 = vmul.f32 0.03125, %v725_v23  ;;  %2594 = vrsqrt.f32 %v765_v41  ;;  %v810_v22 = vmul.f32 %v3155_v16, %v790_v27 }
 0x3ef   :  { %v2585_v33 = vpop.eup %2584  ;;  %v766_v49 = vadd.f32 1e-05, %v750_v4  ;;  %v811_v44 = vmul.f32 %v3155_v16, %v791_v32 }
 0x3f0   :  { %v767_v35 = vadd.f32 1e-05, %v751_v29  ;;  %v2587_v36 = vpop.eup %2586  ;;  %v728_v13 = vpop.xlane.xlu1 %727  ;;  %v3170_v42 = vadd.f32 %v3162_v30, %v810_v22  ;;  %v792_v3 = vmul.f32 %v2585_v33, %v3062_v12 }
 0x3f1   :  { %v731_v38 = vpop.xlane.xlu0 %730  ;;  %2596 = vrsqrt.f32 %v766_v49  ;;  %v752_v1 = vmul.f32 0.03125, %v728_v13  ;;  %v793_v51 = vmul.f32 %v2587_v36, %v3075_v39  ;;  %v3179_v0 = vadd.f32 %v3162_v30, %v811_v44 }
 0x3f2   :  { %v753_v46 = vmul.f32 0.03125, %v731_v38  ;;  %2598 = vrsqrt.f32 %v767_v35  ;;  %v845_v48 = vpack.c.bf16 %v3170_v42, %v3167_v40  ;;  %v812_v50 = vmul.f32 %v3155_v16, %v792_v3 }
 0x3f3   :  { %v2589_v52 = vpop.eup %2588  ;;  %v768_v61 = vadd.f32 1e-05, %v752_v1  ;;  %v813_v24 = vmul.f32 %v3155_v16, %v793_v51 }
 0x3f4   :  { %v769_v11 = vadd.f32 1e-05, %v753_v46  ;;  %v2591_v20 = vpop.eup %2590  ;;  %v734_v60 = vpop.xlane.xlu1 %733  ;;  %2434 = vmatprep.subr.bf16.mxu1 %v845_v48  ;;  %v3182_v5 = vadd.f32 %v3162_v30, %v812_v50  ;;  %v794_v6 = vmul.f32 %v2589_v52, %v3080_v26 }
 0x3f5   :  { %v737_v12 = vpop.xlane.xlu0 %736  ;;  %2600 = vrsqrt.f32 %v768_v61  ;;  %v754_v8 = vmul.f32 0.03125, %v734_v60  ;;  %2435 = vmatpush3.bf16.msra.mxu1 %v845_v48  ;;  %v795_v10 = vmul.f32 %v2591_v20, %v3086_v63  ;;  %v3191_v26 = vadd.f32 %v3162_v30, %v813_v24 }
 0x3f6   :  { %v755_v39 = vmul.f32 0.03125, %v737_v12  ;;  %2602 = vrsqrt.f32 %v769_v11  ;;  %v846_v14 = vpack.c.bf16 %v3182_v5, %v3179_v0  ;;  %v814_v25 = vmul.f32 %v3155_v16, %v794_v6 }
 0x3f7   :  { %v2593_v37 = vpop.eup %2592  ;;  %v770_v15 = vadd.f32 1e-05, %v754_v8  ;;  %v815_v45 = vmul.f32 %v3155_v16, %v795_v10 }
 0x3f8   :  { %v771_v31 = vadd.f32 1e-05, %v755_v39  ;;  %v2595_v18 = vpop.eup %2594  ;;  %v740_v41 = vpop.xlane.xlu1 %739  ;;  %2436 = vmatprep.subr.bf16.mxu1 %v846_v14  ;;  %v3194_v19 = vadd.f32 %v3162_v30, %v814_v25  ;;  %v796_v63 = vmul.f32 %v2593_v37, %v3092_v2 }
 0x3f9   :  { %2604 = vrsqrt.f32 %v770_v15  ;;  %v756_v23 = vmul.f32 0.03125, %v740_v41  ;;  %2437 = vmatpush3.bf16.msra.mxu1 %v846_v14  ;;  %v797_v27 = vmul.f32 %v2595_v18, %v3098_v43  ;;  %v3203_v33 = vadd.f32 %v3162_v30, %v815_v45 }
 0x3fa   :  { %2606 = vrsqrt.f32 %v771_v31  ;;  %v847_v28 = vpack.c.bf16 %v3194_v19, %v3191_v26  ;;  %v816_v4 = vmul.f32 %v3155_v16, %v796_v63 }
 0x3fb   :  { %v2597_v29 = vpop.eup %2596  ;;  %v772_v32 = vadd.f32 1e-05, %v756_v23  ;;  %v817_v43 = vmul.f32 %v3155_v16, %v797_v27 }
 0x3fc   :  { %v2599_v22 = vpop.eup %2598  ;;  %2438 = vmatprep.subr.bf16.mxu1 %v847_v28  ;;  %v3206_v2 = vadd.f32 %v3162_v30, %v816_v4  ;;  %v798_v49 = vmul.f32 %v2597_v29, %v3104_v9 }
 0x3fd   :  { %2608 = vrsqrt.f32 %v772_v32  ;;  %2439 = vmatpush3.bf16.msra.mxu1 %v847_v28  ;;  %v799_v35 = vmul.f32 %v2599_v22, %v3110_v62  ;;  %v3215_v44 = vadd.f32 %v3162_v30, %v817_v43 }
 0x3fe   :  { %v848_v36 = vpack.c.bf16 %v3206_v2, %v3203_v33  ;;  %v818_v13 = vmul.f32 %v3155_v16, %v798_v49 }
 0x3ff   :  { %v2601_v38 = vpop.eup %2600  ;;  %v819_v46 = vmul.f32 %v3155_v16, %v799_v35 }
 0x400   :  { %v2603_v3 = vpop.eup %2602  ;;  %2440 = vmatprep.subr.bf16.mxu1 %v848_v36  ;;  %v3218_v1 = vadd.f32 %v3162_v30, %v818_v13  ;;  %v800_v9 = vmul.f32 %v2601_v38, %v3116_v7 }
 0x401   :  { %2441 = vmatpush3.bf16.msra.mxu1 %v848_v36  ;;  %v801_v62 = vmul.f32 %v2603_v3, %v3122_v34  ;;  %v3227_v61 = vadd.f32 %v3162_v30, %v819_v46  ;;  %v3275_v36 = vld [vmem:[%s3913_s6 + $0x4] ss:$0 sm:$0xff] }
 0x402   :  { %v849_v48 = vpack.c.bf16 %v3218_v1, %v3215_v44  ;;  %v820_v50 = vmul.f32 %v3155_v16, %v800_v9 }
 0x403   :  { %v2605_v51 = vpop.eup %2604  ;;  %v821_v20 = vmul.f32 %v3155_v16, %v801_v62 }
 0x404   :  { %v2607_v52 = vpop.eup %2606  ;;  %2442 = vmatprep.subr.bf16.mxu1 %v849_v48  ;;  %v3230_v11 = vadd.f32 %v3162_v30, %v820_v50  ;;  %v802_v7 = vmul.f32 %v2605_v51, %v3128_v17 }
 0x405   :  { %2443 = vmatpush3.bf16.msra.mxu1 %v849_v48  ;;  %v803_v34 = vmul.f32 %v2607_v52, %v3134_v21  ;;  %v3239_v24 = vadd.f32 %v3162_v30, %v821_v20 }
 0x406   :  { %v850_v60 = vpack.c.bf16 %v3230_v11, %v3227_v61  ;;  %v822_v12 = vmul.f32 %v3155_v16, %v802_v7 }
 0x407   :  { %v2609_v6 = vpop.eup %2608  ;;  %v823_v39 = vmul.f32 %v3155_v16, %v803_v34 }
 0x408   :  { %2444 = vmatprep.subr.bf16.mxu1 %v850_v60  ;;  %v3242_v8 = vadd.f32 %v3162_v30, %v822_v12  ;;  %v804_v17 = vmul.f32 %v2609_v6, %v3140_v47  ;;  %v963_v47 = vpop.permute.xlu0 %962 }
 0x409   :  { %2445 = vmatpush3.bf16.msra.mxu1 %v850_v60  ;;  %v3250_v14 = vadd.f32 %v3162_v30, %v823_v39  ;;  %2466 = vmatprep.subr.bf16.mxu0 %v963_v47 }
 0x40a   :  { %v851_v21 = vpack.c.bf16 %v3242_v8, %v3239_v24  ;;  %v824_v10 = vmul.f32 %v3155_v16, %v804_v17  ;;  %2467 = vmatpush3.bf16.msra.mxu0 %v963_v47  ;;  %v965_v16 = vpop.permute.xlu1 %964 }
 0x40b   :  { %2468 = vmatprep.subr.bf16.mxu0 %v965_v16 }
 0x40c   :  { %2446 = vmatprep.subr.bf16.mxu1 %v851_v21  ;;  %v3253_v25 = vadd.f32 %v3162_v30, %v824_v10 }
 0x40d   :  { %2447 = vmatpush3.bf16.msra.mxu1 %v851_v21 }
 0x40e   :  { %v852_v37 = vpack.c.bf16 %v3253_v25, %v3250_v14  ;;  %2469 = vmatpush3.bf16.msra.mxu0 %v965_v16 }
 0x410   :  { %2448 = vmatprep.subr.bf16.mxu1 %v852_v37 }
 0x411   :  { %2449 = vmatpush3.bf16.msra.mxu1 %v852_v37 }
 0x414   :  { %2451 = vmatmul.mubr.bf16.vlgmr.msra.gmra.mrb[16].mxu1 %v2913_v53 }
 0x415   :  { %2454 = vmatprep.mubr.bf16.mxu1 %v2918_v54 }
 0x41c   :  { %2455 = vmatmul.mubr.bf16.gmra.mrb[20].mxu1 %v2925_v55 }
 0x41d   :  { %2458 = vmatprep.mubr.bf16.mxu1 %v2930_v56 }
 0x424   :  { %2459 = vmatmul.mubr.bf16.gmra.mrb[24].mxu1 %v2937_v57 }
 0x425   :  { %2462 = vmatprep.mubr.bf16.mxu1 %v2942_v58 }
 0x42c   :  { %2463 = vmatmul.mubr.bf16.gmra.mrb[28].mxu1 %v2949_v59 }
 0x4e7   :  { %v2452_v30 = vpop.f32.mrb[16].mxu1 }
 0x4e8   :  { %v887_v53 = vpop.f32.mrb[17].mxu1 }
 0x4e9   :  { %v2453_v15 = vpop.f32.mrb[18].mxu1 }
 0x4ea   :  { %v951_v54 = vpack.c.bf16 %v2453_v15, %v2452_v30  ;;  %v890_v31 = vpop.f32.mrb[19].mxu1 }
 0x4eb   :  { %v950_v55 = vpack.c.bf16 %v890_v31, %v887_v53 }
 0x4ed   :  { %2470 = vmatprep.mubr.msk.bf16.mxu0 %vm426_vm2, %v950_v55 }
 0x4ee   :  { %2471 = vmatmul.mubr.msk.bf16.vlgmr.msra.gmra.mrb[32].mxu0 %vm426_vm2, %v951_v54 }
 0x4ef   :  { %v2456_v56 = vpop.f32.mrb[20].mxu1 }
 0x4f0   :  { %v903_v18 = vpop.f32.mrb[21].mxu1 }
 0x4f1   :  { %v2457_v57 = vpop.f32.mrb[22].mxu1 }
 0x4f2   :  { %v953_v41 = vpack.c.bf16 %v2457_v57, %v2456_v56  ;;  %v906_v58 = vpop.f32.mrb[23].mxu1 }
 0x4f3   :  { %v952_v63 = vpack.c.bf16 %v906_v58, %v903_v18 }
 0x4f5   :  { %2474 = vmatprep.mubr.msk.bf16.mxu0 %vm426_vm2, %v952_v63 }
 0x4f6   :  { %2475 = vmatmul.mubr.msk.bf16.gmra.mrb[36].mxu0 %vm426_vm2, %v953_v41 }
 0x4f7   :  { %v2460_v59 = vpop.f32.mrb[24].mxu1 }
 0x4f8   :  { %v919_v45 = vpop.f32.mrb[25].mxu1 }
 0x4f9   :  { %v2461_v23 = vpop.f32.mrb[26].mxu1 }
 0x4fa   :  { %v955_v27 = vpack.c.bf16 %v2461_v23, %v2460_v59  ;;  %v922_v28 = vpop.f32.mrb[27].mxu1 }
 0x4fb   :  { %v954_v4 = vpack.c.bf16 %v922_v28, %v919_v45 }
 0x4fd   :  { %2478 = vmatprep.mubr.msk.bf16.mxu0 %vm426_vm2, %v954_v4 }
 0x4fe   :  { %2479 = vmatmul.mubr.msk.bf16.gmra.mrb[40].mxu0 %vm426_vm2, %v955_v27 }
 0x4ff   :  { %v2464_v29 = vpop.f32.mrb[28].mxu1 }
 0x500   :  { %v935_v32 = vpop.f32.mrb[29].mxu1 }
 0x501   :  { %v2465_v22 = vpop.f32.mrb[30].mxu1 }
 0x502   :  { %v957_v49 = vpack.c.bf16 %v2465_v22, %v2464_v29  ;;  %v938_v43 = vpop.f32.mrb[31].mxu1 }
 0x503   :  { %v956_v35 = vpack.c.bf16 %v938_v43, %v935_v32 }
 0x505   :  { %2482 = vmatprep.mubr.msk.bf16.mxu0 %vm426_vm2, %v956_v35 }
 0x506   :  { %2483 = vmatmul.mubr.msk.bf16.gmra.mrb[44].mxu0 %vm426_vm2, %v957_v49 }
 0x5c1   :  { %v2472_v13 = vpop.f32.mrb[32].mxu0 }
 0x5c2   :  { %v1026_v38 = vpop.f32.mrb[33].mxu0  ;;  %v1035_v3 = vadd.f32 %v2472_v13, %v3275_v36 }
 0x5c3   :  { %v1027_v9 = vadd.f32 %v3275_v36, %v1026_v38  ;;  %v2473_v46 = vpop.f32.mrb[34].mxu0 }
 0x5c4   :  { %v1038_v62 = vadd.f32 %v2473_v46, %v3275_v36  ;;  %v1029_v48 = vpop.f32.mrb[35].mxu0  ;;  %v1107_v7 = vmul.f32 0.1, %v1035_v3  ;;  %vm1091_vm7 = vcmp.ge.f32.partialorder %v1035_v3, 0.0 }
 0x5c5   :  { %v1105_v50 = vmul.f32 0.1, %v1027_v9  ;;  %v1030_v51 = vadd.f32 %v3275_v36, %v1029_v48  ;;  %vm1089_vm4 = vcmp.ge.f32.partialorder %v1027_v9, 0.0 }
 0x5c6   :  { %v1108_v52 = vmul.f32 0.1, %v1038_v62  ;;  %vm1092_vm5 = vcmp.ge.f32.partialorder %v1038_v62, 0.0  ;;  %v3293_v16 = vsel %vm1091_vm7, %v1035_v3, %v1107_v7  ;;  %vm2731_vm7 = vmmov 0  }
 0x5c7   :  { %v1106_v20 = vmul.f32 0.1, %v1030_v51  ;;  %v3281_v34 = vsel %vm1089_vm4, %v1027_v9, %v1105_v50  ;;  %vm1090_vm6 = vcmp.ge.f32.partialorder %v1030_v51, 0.0  ;;  %v1143_v56 = vsel %vm426_vm2, %v3293_v16, 0.0 }
 0x5c8   :  { %v1137_v60 = vsel %vm426_vm2, %v3281_v34, 0.0  ;;  %v3287_v17 = vsel %vm1092_vm5, %v1038_v62, %v1108_v52  ;;  %vm1574_vm5 = vcmask 130048  }
 0x5c9   :  { %v2476_v12 = vpop.f32.mrb[36].mxu0  ;;  %1138 = vadd.xlane.f32.xlu1 %v1137_v60  ;;  %v3285_v6 = vsel %vm1090_vm6, %v1030_v51, %v1106_v20  ;;  %v1146_v15 = vsel %vm426_vm2, %v3287_v17, 0.0  ;;  %vm1696_vm6 = vcmask 31744  }
 0x5ca   :  { %v1051_v39 = vadd.f32 %v2476_v12, %v3275_v36  ;;  %v1042_v21 = vpop.f32.mrb[37].mxu0  ;;  %v1140_v10 = vsel %vm426_vm2, %v3285_v6, 0.0 }
 0x5cb   :  { %v1043_v37 = vadd.f32 %v3275_v36, %v1042_v21  ;;  %v2477_v47 = vpop.f32.mrb[38].mxu0  ;;  %1141 = vadd.xlane.f32.xlu0 %v1140_v10 }
 0x5cc   :  { %v1054_v30 = vadd.f32 %v2477_v47, %v3275_v36  ;;  %v1045_v53 = vpop.f32.mrb[39].mxu0  ;;  %v1111_v55 = vmul.f32 0.1, %v1051_v39  ;;  %vm1095_vm10 = vcmp.ge.f32.partialorder %v1051_v39, 0.0 }
 0x5cd   :  { %v1109_v54 = vmul.f32 0.1, %v1043_v37  ;;  %v1046_v31 = vadd.f32 %v3275_v36, %v1045_v53  ;;  %1147 = vadd.xlane.f32.xlu1 %v1146_v15  ;;  %vm1093_vm8 = vcmp.ge.f32.partialorder %v1043_v37, 0.0 }
 0x5ce   :  { %v1112_v18 = vmul.f32 0.1, %v1054_v30  ;;  %vm1096_vm11 = vcmp.ge.f32.partialorder %v1054_v30, 0.0  ;;  %v3311_v29 = vsel %vm1095_vm10, %v1051_v39, %v1111_v55 }
 0x5cf   :  { %v1110_v57 = vmul.f32 0.1, %v1046_v31  ;;  %1144 = vadd.xlane.f32.xlu0 %v1143_v56  ;;  %v3301_v41 = vsel %vm1093_vm8, %v1043_v37, %v1109_v54  ;;  %vm1094_vm9 = vcmp.ge.f32.partialorder %v1046_v31, 0.0  ;;  %v1155_v38 = vsel %vm426_vm2, %v3311_v29, 0.0 }
 0x5d0   :  { %v1149_v23 = vsel %vm426_vm2, %v3301_v41, 0.0  ;;  %v3313_v32 = vsel %vm1096_vm11, %v1054_v30, %v1112_v18  ;;  %vm2177_vm8 = vcmask 523520  }
 0x5d1   :  { %v2480_v58 = vpop.f32.mrb[40].mxu0  ;;  %v3303_v63 = vsel %vm1094_vm9, %v1046_v31, %v1110_v57  ;;  %v1158_v3 = vsel %vm426_vm2, %v3313_v32, 0.0 }
 0x5d2   :  { %v1067_v59 = vadd.f32 %v2480_v58, %v3275_v36  ;;  %v1058_v45 = vpop.f32.mrb[41].mxu0  ;;  %v1152_v27 = vsel %vm426_vm2, %v3303_v63, 0.0 }
 0x5d3   :  { %v1059_v28 = vadd.f32 %v3275_v36, %v1058_v45  ;;  %v2481_v4 = vpop.f32.mrb[42].mxu0  ;;  %1150 = vadd.xlane.f32.xlu0 %v1149_v23  ;;  %1153 = vadd.xlane.f32.xlu1 %v1152_v27 }
 0x5d4   :  { %v1070_v22 = vadd.f32 %v2481_v4, %v3275_v36  ;;  %v1061_v49 = vpop.f32.mrb[43].mxu0  ;;  %v1115_v13 = vmul.f32 0.1, %v1067_v59  ;;  %vm1099_vm14 = vcmp.ge.f32.partialorder %v1067_v59, 0.0 }
 0x5d5   :  { %v1113_v43 = vmul.f32 0.1, %v1059_v28  ;;  %v1062_v35 = vadd.f32 %v3275_v36, %v1061_v49  ;;  %vm1097_vm12 = vcmp.ge.f32.partialorder %v1059_v28, 0.0 }
 0x5d6   :  { %v1116_v9 = vmul.f32 0.1, %v1070_v22  ;;  %vm1100_vm15 = vcmp.ge.f32.partialorder %v1070_v22, 0.0  ;;  %v3331_v39 = vsel %vm1099_vm14, %v1067_v59, %v1115_v13 }
 0x5d7   :  { %v1114_v46 = vmul.f32 0.1, %v1062_v35  ;;  %1156 = vadd.xlane.f32.xlu0 %v1155_v38  ;;  %1159 = vadd.xlane.f32.xlu1 %v1158_v3  ;;  %v3321_v62 = vsel %vm1097_vm12, %v1059_v28, %v1113_v43  ;;  %vm1098_vm13 = vcmp.ge.f32.partialorder %v1062_v35, 0.0  ;;  %v1167_v15 = vsel %vm426_vm2, %v3331_v39, 0.0 }
 0x5d8   :  { %v1161_v7 = vsel %vm426_vm2, %v3321_v62, 0.0  ;;  %v3333_v21 = vsel %vm1100_vm15, %v1070_v22, %v1116_v9 }
 0x5d9   :  { %v2484_v48 = vpop.f32.mrb[44].mxu0  ;;  %v3323_v50 = vsel %vm1098_vm13, %v1062_v35, %v1114_v46  ;;  %v1170_v54 = vsel %vm426_vm2, %v3333_v21, 0.0 }
 0x5da   :  { %v1083_v51 = vadd.f32 %v2484_v48, %v3275_v36  ;;  %v1074_v52 = vpop.f32.mrb[45].mxu0  ;;  %v1164_v20 = vsel %vm426_vm2, %v3323_v50, 0.0 }
 0x5db   :  { %v1075_v60 = vadd.f32 %v3275_v36, %v1074_v52  ;;  %v2485_v12 = vpop.f32.mrb[46].mxu0  ;;  %1162 = vadd.xlane.f32.xlu0 %v1161_v7  ;;  %1165 = vadd.xlane.f32.xlu1 %v1164_v20 }
 0x5dc   :  { %v1086_v10 = vadd.f32 %v2485_v12, %v3275_v36  ;;  %v1077_v37 = vpop.f32.mrb[47].mxu0  ;;  %v1119_v53 = vmul.f32 0.1, %v1083_v51  ;;  %vm1103_vm3 = vcmp.ge.f32.partialorder %v1083_v51, 0.0 }
 0x5dd   :  { %v1117_v47 = vmul.f32 0.1, %v1075_v60  ;;  %v1078_v30 = vadd.f32 %v3275_v36, %v1077_v37  ;;  %vm1101_vm0 = vcmp.ge.f32.partialorder %v1075_v60, 0.0 }
 0x5de   :  { %v1120_v31 = vmul.f32 0.1, %v1086_v10  ;;  %vm1104_vm4 = vcmp.ge.f32.partialorder %v1086_v10, 0.0  ;;  %v3349_v58 = vsel %vm1103_vm3, %v1083_v51, %v1119_v53 }
 0x5df   :  { %v1118_v55 = vmul.f32 0.1, %v1078_v30  ;;  %1168 = vadd.xlane.f32.xlu0 %v1167_v15  ;;  %1171 = vadd.xlane.f32.xlu1 %v1170_v54  ;;  %v3341_v56 = vsel %vm1101_vm0, %v1075_v60, %v1117_v47  ;;  %vm1102_vm1 = vcmp.ge.f32.partialorder %v1078_v30, 0.0  ;;  %v1179_v45 = vsel %vm426_vm2, %v3349_v58, 0.0 }
 0x5e0   :  { %v1173_v36 = vsel %vm426_vm2, %v3341_v56, 0.0  ;;  %v3351_v59 = vsel %vm1104_vm4, %v1086_v10, %v1120_v31 }
 0x5e1   :  { %v3343_v18 = vsel %vm1102_vm1, %v1078_v30, %v1118_v55  ;;  %v1182_v23 = vsel %vm426_vm2, %v3351_v59, 0.0 }
 0x5e2   :  { %v1176_v57 = vsel %vm426_vm2, %v3343_v18, 0.0 }
 0x5e3   :  { %1174 = vadd.xlane.f32.xlu0 %v1173_v36  ;;  %1177 = vadd.xlane.f32.xlu1 %v1176_v57 }
 0x5e7   :  { %1180 = vadd.xlane.f32.xlu0 %v1179_v45  ;;  %1183 = vadd.xlane.f32.xlu1 %v1182_v23 }
 0x656   :  { %v1139_v27 = vpop.xlane.xlu1 %1138 }
 0x657   :  { %v1185_v22 = vmul.f32 0.03125, %v1139_v27 }
 0x658   :  { %v1142_v28 = vpop.xlane.xlu0 %1141 }
 0x659   :  { %v1186_v4 = vmul.f32 0.03125, %v1142_v28  ;;  %v3364_v9 = vsub.f32 %v3281_v34, %v1185_v22 }
 0x65a   :  { %v1148_v49 = vpop.xlane.xlu1 %1147 }
 0x65b   :  { %v1188_v43 = vmul.f32 0.03125, %v1148_v49  ;;  %v3358_v13 = vsub.f32 %v3285_v6, %v1186_v4  ;;  %v1217_v34 = vmul.f32 %v3364_v9, %v3364_v9 }
 0x65c   :  { %v1145_v35 = vpop.xlane.xlu0 %1144 }
 0x65d   :  { %v3361_v38 = vsub.f32 %v3287_v17, %v1188_v43  ;;  %v1187_v3 = vmul.f32 0.03125, %v1145_v35  ;;  %v1218_v17 = vmul.f32 %v3358_v13, %v3358_v13  ;;  %v1233_v53 = vsel %vm426_vm2, %v1217_v34, 0.0 }
 0x65f   :  { %v3367_v46 = vsub.f32 %v3293_v16, %v1187_v3  ;;  %v1220_v48 = vmul.f32 %v3361_v38, %v3361_v38  ;;  %v1236_v30 = vsel %vm426_vm2, %v1218_v17, 0.0 }
 0x660   :  { %v1151_v51 = vpop.xlane.xlu0 %1150  ;;  %v1154_v52 = vpop.xlane.xlu1 %1153 }
 0x661   :  { %v1242_v7 = vsel %vm426_vm2, %v1220_v48, 0.0  ;;  %v1219_v6 = vmul.f32 %v3367_v46, %v3367_v46  ;;  %v1189_v20 = vmul.f32 0.03125, %v1151_v51  ;;  %v1190_v16 = vmul.f32 0.03125, %v1154_v52 }
 0x662   :  { %1243 = vadd.xlane.f32.xlu1 %v1242_v7 }
 0x663   :  { %v1239_v60 = vsel %vm426_vm2, %v1219_v6, 0.0  ;;  %v3382_v15 = vsub.f32 %v3301_v41, %v1189_v20  ;;  %v3385_v54 = vsub.f32 %v3303_v63, %v1190_v16 }
 0x664   :  { %1240 = vadd.xlane.f32.xlu0 %v1239_v60  ;;  %v1157_v12 = vpop.xlane.xlu0 %1156  ;;  %v1160_v10 = vpop.xlane.xlu1 %1159 }
 0x665   :  { %v1191_v37 = vmul.f32 0.03125, %v1157_v12  ;;  %v1192_v47 = vmul.f32 0.03125, %v1160_v10 }
 0x666   :  { %1237 = vadd.xlane.f32.xlu1 %v1236_v30 }
 0x667   :  { %v3388_v31 = vsub.f32 %v3311_v29, %v1191_v37  ;;  %v3391_v55 = vsub.f32 %v3313_v32, %v1192_v47  ;;  %v1221_v29 = vmul.f32 %v3382_v15, %v3382_v15  ;;  %v1222_v32 = vmul.f32 %v3385_v54, %v3385_v54 }
 0x668   :  { %v1163_v36 = vpop.xlane.xlu0 %1162  ;;  %1234 = vadd.xlane.f32.xlu0 %v1233_v53  ;;  %v1166_v57 = vpop.xlane.xlu1 %1165 }
 0x669   :  { %v1223_v45 = vmul.f32 %v3388_v31, %v3388_v31  ;;  %v1224_v23 = vmul.f32 %v3391_v55, %v3391_v55  ;;  %v1193_v41 = vmul.f32 0.03125, %v1163_v36  ;;  %v1194_v27 = vmul.f32 0.03125, %v1166_v57 }
 0x66a   :  { %v1245_v52 = vsel %vm426_vm2, %v1221_v29, 0.0  ;;  %v1248_v7 = vsel %vm426_vm2, %v1222_v32, 0.0  ;;  %v2722_v29 = vld [vmem:[%s3912_s3 + $0x8] sm:$0xff]   ;;  %v2723_v32 = vld [vmem:[%s3912_s3] sm:$0xff]  }
 0x66b   :  { %v1251_v63 = vsel %vm426_vm2, %v1223_v45, 0.0  ;;  %v1254_v28 = vsel %vm426_vm2, %v1224_v23, 0.0  ;;  %v3404_v35 = vsub.f32 %v3321_v62, %v1193_v41  ;;  %v3407_v3 = vsub.f32 %v3323_v50, %v1194_v27 }
 0x66c   :  { %v1169_v4 = vpop.xlane.xlu0 %1168  ;;  %1252 = vadd.xlane.f32.xlu0 %v1251_v63  ;;  %1255 = vadd.xlane.f32.xlu1 %v1254_v28  ;;  %v1172_v22 = vpop.xlane.xlu1 %1171 }
 0x66d   :  { %v1195_v49 = vmul.f32 0.03125, %v1169_v4  ;;  %v1196_v43 = vmul.f32 0.03125, %v1172_v22 }
 0x66f   :  { %v3410_v48 = vsub.f32 %v3331_v39, %v1195_v49  ;;  %v3413_v51 = vsub.f32 %v3333_v21, %v1196_v43  ;;  %v1225_v39 = vmul.f32 %v3404_v35, %v3404_v35  ;;  %v1226_v21 = vmul.f32 %v3407_v3, %v3407_v3 }
 0x670   :  { %v1175_v6 = vpop.xlane.xlu0 %1174  ;;  %1246 = vadd.xlane.f32.xlu0 %v1245_v52  ;;  %1249 = vadd.xlane.f32.xlu1 %v1248_v7  ;;  %v1178_v17 = vpop.xlane.xlu1 %1177 }
 0x671   :  { %v1227_v62 = vmul.f32 %v3410_v48, %v3410_v48  ;;  %v1228_v50 = vmul.f32 %v3413_v51, %v3413_v51  ;;  %v1197_v34 = vmul.f32 0.03125, %v1175_v6  ;;  %v1198_v20 = vmul.f32 0.03125, %v1178_v17 }
 0x672   :  { %v1257_v30 = vsel %vm426_vm2, %v1225_v39, 0.0  ;;  %v1260_v53 = vsel %vm426_vm2, %v1226_v21, 0.0 }
 0x673   :  { %v1263_v16 = vsel %vm426_vm2, %v1227_v62, 0.0  ;;  %v1266_v60 = vsel %vm426_vm2, %v1228_v50, 0.0  ;;  %v3430_v36 = vsub.f32 %v3341_v56, %v1197_v34  ;;  %v3433_v57 = vsub.f32 %v3343_v18, %v1198_v20 }
 0x674   :  { %v1181_v12 = vpop.xlane.xlu0 %1180  ;;  %1264 = vadd.xlane.f32.xlu0 %v1263_v16  ;;  %1267 = vadd.xlane.f32.xlu1 %v1266_v60  ;;  %v1184_v10 = vpop.xlane.xlu1 %1183 }
 0x675   :  { %v1199_v37 = vmul.f32 0.03125, %v1181_v12  ;;  %v1200_v47 = vmul.f32 0.03125, %v1184_v10  ;;  %v1229_v18 = vmul.f32 %v3430_v36, %v3430_v36 }
 0x677   :  { %v3436_v45 = vsub.f32 %v3349_v58, %v1199_v37  ;;  %v3439_v23 = vsub.f32 %v3351_v59, %v1200_v47  ;;  %v1230_v58 = vmul.f32 %v3433_v57, %v3433_v57  ;;  %v1269_v59 = vsel %vm426_vm2, %v1229_v18, 0.0 }
 0x678   :  { %1258 = vadd.xlane.f32.xlu0 %v1257_v30  ;;  %1261 = vadd.xlane.f32.xlu1 %v1260_v53 }
 0x679   :  { %v1231_v41 = vmul.f32 %v3436_v45, %v3436_v45  ;;  %v1232_v27 = vmul.f32 %v3439_v23, %v3439_v23  ;;  %v1272_v28 = vsel %vm426_vm2, %v1230_v58, 0.0 }
 0x67b   :  { %v1275_v56 = vsel %vm426_vm2, %v1231_v41, 0.0  ;;  %v1278_v63 = vsel %vm426_vm2, %v1232_v27, 0.0 }
 0x67c   :  { %1276 = vadd.xlane.f32.xlu0 %v1275_v56  ;;  %1279 = vadd.xlane.f32.xlu1 %v1278_v63 }
 0x680   :  { %1270 = vadd.xlane.f32.xlu0 %v1269_v59  ;;  %1273 = vadd.xlane.f32.xlu1 %v1272_v28 }
 0x691   :  { %1415 = vrot.lane.b32.xlu1 %v2722_v29, %s2727_s14 }
 0x696   :  { %1413 = vrot.lane.b32.xlu0 %v2723_v32, %s2727_s14 }
 0x6ef   :  { %v1244_v4 = vpop.xlane.xlu1 %1243 }
 0x6f0   :  { %v1284_v7 = vmul.f32 0.03125, %v1244_v4  ;;  %v3463_v4 = vld [vmem:[%s3913_s6 + $0x5] ss:$0 sm:$0xff] }
 0x6f1   :  { %v1241_v22 = vpop.xlane.xlu0 %1240 }
 0x6f2   :  { %v1283_v49 = vmul.f32 0.03125, %v1241_v22  ;;  %v1300_v21 = vadd.f32 1e-05, %v1284_v7 }
 0x6f3   :  { %v1238_v43 = vpop.xlane.xlu1 %1237 }
 0x6f4   :  { %v1282_v52 = vmul.f32 0.03125, %v1238_v43  ;;  %v1299_v6 = vadd.f32 1e-05, %v1283_v49 }
 0x6f5   :  { %v1235_v17 = vpop.xlane.xlu0 %1234 }
 0x6f6   :  { %v1298_v62 = vadd.f32 1e-05, %v1282_v52  ;;  %v1281_v50 = vmul.f32 0.03125, %v1235_v17  ;;  %v3470_v17 = vld [vmem:[%s3913_s6 + $0x6] ss:$0 sm:$0xff] }
 0x6f8   :  { %2610 = vrsqrt.f32 %v1298_v62  ;;  %v1297_v39 = vadd.f32 1e-05, %v1281_v50 }
 0x6f9   :  { %2612 = vrsqrt.f32 %v1299_v6  ;;  %v1253_v34 = vpop.xlane.xlu0 %1252  ;;  %v1256_v20 = vpop.xlane.xlu1 %1255 }
 0x6fa   :  { %2614 = vrsqrt.f32 %v1297_v39  ;;  %v1287_v16 = vmul.f32 0.03125, %v1253_v34  ;;  %v1288_v60 = vmul.f32 0.03125, %v1256_v20 }
 0x6fb   :  { %2616 = vrsqrt.f32 %v1300_v21 }
 0x6fc   :  { %v1303_v12 = vadd.f32 1e-05, %v1287_v16  ;;  %v1304_v10 = vadd.f32 1e-05, %v1288_v60 }
 0x6fd   :  { %v1247_v37 = vpop.xlane.xlu0 %1246  ;;  %v1250_v47 = vpop.xlane.xlu1 %1249 }
 0x6fe   :  { %v1285_v30 = vmul.f32 0.03125, %v1247_v37  ;;  %v1286_v53 = vmul.f32 0.03125, %v1250_v47  ;;  %2618 = vrsqrt.f32 %v1303_v12 }
 0x6ff   :  { %2620 = vrsqrt.f32 %v1304_v10 }
 0x700   :  { %v1301_v41 = vadd.f32 1e-05, %v1285_v30  ;;  %v1302_v27 = vadd.f32 1e-05, %v1286_v53 }
 0x701   :  { %v1265_v56 = vpop.xlane.xlu0 %1264  ;;  %v1268_v63 = vpop.xlane.xlu1 %1267 }
 0x702   :  { %v2611_v18 = vpop.eup %2610  ;;  %2622 = vrsqrt.f32 %v1301_v41  ;;  %v1291_v58 = vmul.f32 0.03125, %v1265_v56  ;;  %v1292_v59 = vmul.f32 0.03125, %v1268_v63 }
 0x703   :  { %v2613_v28 = vpop.eup %2612  ;;  %v1330_v29 = vmul.f32 %v2611_v18, %v3358_v13  ;;  %2624 = vrsqrt.f32 %v1302_v27 }
 0x704   :  { %v2615_v32 = vpop.eup %2614  ;;  %v1307_v22 = vadd.f32 1e-05, %v1291_v58  ;;  %v1308_v52 = vadd.f32 1e-05, %v1292_v59  ;;  %v1331_v39 = vmul.f32 %v2613_v28, %v3367_v46 }
 0x705   :  { %v1350_v49 = vmul.f32 %v3463_v4, %v1330_v29  ;;  %v1329_v43 = vmul.f32 %v2615_v32, %v3364_v9  ;;  %v1259_v7 = vpop.xlane.xlu0 %1258  ;;  %v1262_v6 = vpop.xlane.xlu1 %1261 }
 0x706   :  { %v1289_v13 = vmul.f32 0.03125, %v1259_v7  ;;  %v1290_v62 = vmul.f32 0.03125, %v1262_v6  ;;  %v2617_v50 = vpop.eup %2616  ;;  %2626 = vrsqrt.f32 %v1307_v22  ;;  %v1351_v46 = vmul.f32 %v3463_v4, %v1331_v39 }
 0x707   :  { %v1349_v21 = vmul.f32 %v3463_v4, %v1329_v43  ;;  %v1370_v34 = vadd.f32 %v3470_v17, %v1350_v49  ;;  %2628 = vrsqrt.f32 %v1308_v52  ;;  %v1332_v37 = vmul.f32 %v2617_v50, %v3361_v38 }
 0x708   :  { %v1305_v20 = vadd.f32 1e-05, %v1289_v13  ;;  %v1306_v9 = vadd.f32 1e-05, %v1290_v62  ;;  %v2619_v10 = vpop.eup %2618 }
 0x709   :  { %v1277_v16 = vpop.xlane.xlu0 %1276  ;;  %v1280_v60 = vpop.xlane.xlu1 %1279  ;;  %v1369_v12 = vadd.f32 %v3470_v17, %v1349_v21  ;;  %v3482_v27 = vadd.f32 %v1370_v34, %v3170_v42  ;;  %v1352_v32 = vmul.f32 %v3463_v4, %v1332_v37  ;;  %v1371_v42 = vadd.f32 %v3470_v17, %v1351_v46 }
 0x70a   :  { %2630 = vrsqrt.f32 %v1305_v20  ;;  %v1295_v47 = vmul.f32 0.03125, %v1277_v16  ;;  %v1296_v30 = vmul.f32 0.03125, %v1280_v60  ;;  %v2621_v53 = vpop.eup %2620  ;;  %v1335_v43 = vmul.f32 %v2619_v10, %v3388_v31 }
 0x70b   :  { %2632 = vrsqrt.f32 %v1306_v9  ;;  %v3479_v41 = vadd.f32 %v1369_v12, %v3167_v40  ;;  %v1336_v52 = vmul.f32 %v2621_v53, %v3391_v55  ;;  %v1372_v21 = vadd.f32 %v3470_v17, %v1352_v32 }
 0x70c   :  { %v2623_v56 = vpop.eup %2622  ;;  %v1311_v63 = vadd.f32 1e-05, %v1295_v47  ;;  %v1312_v59 = vadd.f32 1e-05, %v1296_v30  ;;  %v1355_v34 = vmul.f32 %v3463_v4, %v1335_v43  ;;  %v3501_v16 = vadd.f32 %v1371_v42, %v3179_v0 }
 0x70d   :  { %v2625_v18 = vpop.eup %2624  ;;  %v1333_v58 = vmul.f32 %v2623_v56, %v3382_v15  ;;  %v1271_v38 = vpop.xlane.xlu0 %1270  ;;  %v1401_v29 = vpack.c.bf16 %v3482_v27, %v3479_v41  ;;  %v1356_v20 = vmul.f32 %v3463_v4, %v1336_v52  ;;  %v3511_v47 = vadd.f32 %v1372_v21, %v3182_v5 }
 0x70e   :  { %v1274_v28 = vpop.xlane.xlu1 %1273  ;;  %v1334_v22 = vmul.f32 %v2625_v18, %v3385_v54  ;;  %v1293_v40 = vmul.f32 0.03125, %v1271_v38  ;;  %2634 = vrsqrt.f32 %v1311_v63  ;;  %v1375_v46 = vadd.f32 %v3470_v17, %v1355_v34 }
 0x70f   :  { %v1294_v49 = vmul.f32 0.03125, %v1274_v28  ;;  %v1353_v15 = vmul.f32 %v3463_v4, %v1333_v58  ;;  %2490 = vmatprep.mubr.msk.bf16.mxu1 %vm426_vm2, %v1401_v29  ;;  %2636 = vrsqrt.f32 %v1312_v59 }
 0x710   :  { %v1354_v7 = vmul.f32 %v3463_v4, %v1334_v22  ;;  %v1309_v6 = vadd.f32 1e-05, %v1293_v40  ;;  %v2627_v39 = vpop.eup %2626 }
 0x711   :  { %v1310_v13 = vadd.f32 1e-05, %v1294_v49  ;;  %v1414_v62 = vpop.permute.xlu0 %1413  ;;  %v1373_v50 = vadd.f32 %v3470_v17, %v1353_v15  ;;  %v2629_v55 = vpop.eup %2628  ;;  %v1339_v53 = vmul.f32 %v2627_v39, %v3410_v48 }
 0x712   :  { %v1416_v54 = vpop.permute.xlu1 %1415  ;;  %2638 = vrsqrt.f32 %v1309_v6  ;;  %2486 = vmatprep.subr.bf16.mxu1 %v1414_v62  ;;  %v1374_v31 = vadd.f32 %v3470_v17, %v1354_v7 }
 0x713   :  { %2640 = vrsqrt.f32 %v1310_v13  ;;  %2487 = vmatpush3.bf16.msra.mxu1 %v1414_v62  ;;  %v3505_v10 = vadd.f32 %v1373_v50, %v3191_v26  ;;  %v1340_v26 = vmul.f32 %v2629_v55, %v3413_v51  ;;  %v1359_v58 = vmul.f32 %v3463_v4, %v1339_v53 }
 0x714   :  { %v2631_v9 = vpop.eup %2630  ;;  %2488 = vmatprep.subr.bf16.mxu1 %v1416_v54  ;;  %v3508_v37 = vadd.f32 %v1374_v31, %v3194_v19  ;;  %v1402_v19 = vpack.c.bf16 %v3511_v47, %v3501_v16  ;;  %v3530_v51 = vadd.f32 %v1375_v46, %v3203_v33 }
 0x715   :  { %v2633_v60 = vpop.eup %2632  ;;  %v1337_v12 = vmul.f32 %v2631_v9, %v3404_v35  ;;  %v1376_v35 = vadd.f32 %v3470_v17, %v1356_v20  ;;  %v1360_v28 = vmul.f32 %v3463_v4, %v1340_v26  ;;  %v1379_v42 = vadd.f32 %v3470_v17, %v1359_v58 }
 0x716   :  { %v1338_v30 = vmul.f32 %v2633_v60, %v3407_v3  ;;  %v1403_v5 = vpack.c.bf16 %v3508_v37, %v3505_v10 }
 0x717   :  { %v1357_v0 = vmul.f32 %v3463_v4, %v1337_v12  ;;  %2489 = vmatpush3.bf16.msra.mxu1 %v1416_v54  ;;  %v3533_v59 = vadd.f32 %v1376_v35, %v3206_v2 }
 0x718   :  { %v1358_v56 = vmul.f32 %v3463_v4, %v1338_v30  ;;  %v2635_v48 = vpop.eup %2634 }
 0x719   :  { %v1377_v3 = vadd.f32 %v3470_v17, %v1357_v0  ;;  %v2637_v18 = vpop.eup %2636  ;;  %v1404_v2 = vpack.c.bf16 %v3533_v59, %v3530_v51  ;;  %v1343_v43 = vmul.f32 %v2635_v48, %v3436_v45 }
 0x71a   :  { %2491 = vmatmul.mubr.msk.bf16.vlgmr.msra.gmra.mrb[32].mxu1 %vm426_vm2, %v1402_v19  ;;  %v1378_v63 = vadd.f32 %v3470_v17, %v1358_v56  ;;  %v1344_v52 = vmul.f32 %v2637_v18, %v3439_v23  ;;  %v3561_v23 = vadd.f32 %v1379_v42, %v3227_v61 }
 0x71b   :  { %2494 = vmatprep.mubr.msk.bf16.mxu1 %vm426_vm2, %v1403_v5  ;;  %v3538_v22 = vadd.f32 %v1377_v3, %v3215_v44  ;;  %v1380_v44 = vadd.f32 %v3470_v17, %v1360_v28  ;;  %v1363_v7 = vmul.f32 %v3463_v4, %v1343_v43 }
 0x71c   :  { %v2639_v38 = vpop.eup %2638  ;;  %v3541_v40 = vadd.f32 %v1378_v63, %v3218_v1  ;;  %v1364_v45 = vmul.f32 %v3463_v4, %v1344_v52 }
 0x71d   :  { %v2641_v29 = vpop.eup %2640  ;;  %v1341_v32 = vmul.f32 %v2639_v38, %v3430_v36  ;;  %v3564_v6 = vadd.f32 %v1380_v44, %v3230_v11  ;;  %v1383_v50 = vadd.f32 %v3470_v17, %v1363_v7 }
 0x71e   :  { %v1342_v49 = vmul.f32 %v2641_v29, %v3433_v57  ;;  %v1405_v1 = vpack.c.bf16 %v3541_v40, %v3538_v22  ;;  %v1384_v39 = vadd.f32 %v3470_v17, %v1364_v45 }
 0x71f   :  { %v1361_v33 = vmul.f32 %v3463_v4, %v1341_v32  ;;  %v1406_v54 = vpack.c.bf16 %v3564_v6, %v3561_v23  ;;  %v3581_v11 = vadd.f32 %v1383_v50, %v3250_v14 }
 0x720   :  { %v1362_v36 = vmul.f32 %v3463_v4, %v1342_v49  ;;  %v2577_v4 = vld [vmem:[%s3915_s5] sm:$0xff]  }
 0x721   :  { %v1381_v57 = vadd.f32 %v3470_v17, %v1361_v33  ;;  %2506 = vmatprep.subr.bf16.mxu0 %v2577_v4 }
 0x722   :  { %2495 = vmatmul.mubr.msk.bf16.gmra.mrb[36].mxu1 %vm426_vm2, %v1404_v2  ;;  %v1382_v15 = vadd.f32 %v3470_v17, %v1362_v36  ;;  %2507 = vmatpush3.bf16.msra.mxu0 %v2577_v4  ;;  %v2251_v17 = vld [vmem:[%s3913_s6 + $0x7] ss:$0 sm:$0xff] }
 0x723   :  { %2498 = vmatprep.mubr.msk.bf16.mxu1 %vm426_vm2, %v1405_v1  ;;  %v3567_v13 = vadd.f32 %v1381_v57, %v3239_v24  ;;  %v3584_v24 = vadd.f32 %v1384_v39, %v3253_v25 }
 0x724   :  { %v3570_v62 = vadd.f32 %v1382_v15, %v3242_v8 }
 0x725   :  { %v1408_v8 = vpack.c.bf16 %v3584_v24, %v3581_v11 }
 0x726   :  { %v1407_v61 = vpack.c.bf16 %v3570_v62, %v3567_v13 }
 0x72a   :  { %2499 = vmatmul.mubr.msk.bf16.gmra.mrb[40].mxu1 %vm426_vm2, %v1406_v54 }
 0x72b   :  { %2502 = vmatprep.mubr.msk.bf16.mxu1 %vm426_vm2, %v1407_v61 }
 0x732   :  { %2503 = vmatmul.mubr.msk.bf16.gmra.mrb[44].mxu1 %vm426_vm2, %v1408_v8 }
 0x7ed   :  { %v2492_v14 = vpop.f32.mrb[32].mxu1 }
 0x7ee   :  { %v1486_v21 = vadd.f32 %v2492_v14, %v2251_v17  ;;  %v1477_v31 = vpop.f32.mrb[33].mxu1 }
 0x7ef   :  { %v1478_v25 = vadd.f32 %v2251_v17, %v1477_v31  ;;  %v2493_v55 = vpop.f32.mrb[34].mxu1 }
 0x7f0   :  { %2642 = vtanh.f32 %v1486_v21  ;;  %v1489_v34 = vadd.f32 %v2493_v55, %v2251_v17  ;;  %v1480_v20 = vpop.f32.mrb[35].mxu1 }
 0x7f1   :  { %2644 = vtanh.f32 %v1478_v25  ;;  %v1481_v9 = vadd.f32 %v2251_v17, %v1480_v20 }
 0x7f2   :  { %2646 = vtanh.f32 %v1489_v34 }
 0x7f3   :  { %2648 = vtanh.f32 %v1481_v9 }
 0x7f5   :  { %v2496_v60 = vpop.f32.mrb[36].mxu1 }
 0x7f6   :  { %v1502_v12 = vadd.f32 %v2496_v60, %v2251_v17  ;;  %v1493_v30 = vpop.f32.mrb[37].mxu1  ;;  %v3606_v60 = vld [vmem:[%s3913_s6 + $0x8] ss:$0 sm:$0xff] }
 0x7f7   :  { %v1494_v53 = vadd.f32 %v2251_v17, %v1493_v30  ;;  %v2497_v0 = vpop.f32.mrb[38].mxu1 }
 0x7f8   :  { %2650 = vtanh.f32 %v1502_v12  ;;  %v1505_v46 = vadd.f32 %v2497_v0, %v2251_v17  ;;  %v1496_v35 = vpop.f32.mrb[39].mxu1 }
 0x7f9   :  { %2652 = vtanh.f32 %v1494_v53  ;;  %v1497_v26 = vadd.f32 %v2251_v17, %v1496_v35 }
 0x7fa   :  { %v2643_v56 = vpop.eup %2642  ;;  %2654 = vtanh.f32 %v1505_v46 }
 0x7fb   :  { %v2645_v19 = vpop.eup %2644  ;;  %2656 = vtanh.f32 %v1497_v26 }
 0x7fc   :  { %v2647_v5 = vpop.eup %2646 }
 0x7fd   :  { %v2649_v3 = vpop.eup %2648  ;;  %v1557_v48 = vpack.c.bf16 %v2647_v5, %v2643_v56  ;;  %v2500_v63 = vpop.f32.mrb[40].mxu1 }
 0x7fe   :  { %v1518_v18 = vadd.f32 %v2500_v63, %v2251_v17  ;;  %v1509_v58 = vpop.f32.mrb[41].mxu1  ;;  %v1556_v38 = vpack.c.bf16 %v2649_v3, %v2645_v19 }
 0x7ff   :  { %v1510_v28 = vadd.f32 %v2251_v17, %v1509_v58  ;;  %v2501_v29 = vpop.f32.mrb[42].mxu1 }
 0x800   :  { %2658 = vtanh.f32 %v1518_v18  ;;  %v1521_v32 = vadd.f32 %v2501_v29, %v2251_v17  ;;  %v1512_v49 = vpop.f32.mrb[43].mxu1  ;;  %2508 = vmatprep.mubr.msk.bf16.mxu0 %vm1574_vm5, %v1556_v38 }
 0x801   :  { %2660 = vtanh.f32 %v1510_v28  ;;  %v1513_v33 = vadd.f32 %v2251_v17, %v1512_v49  ;;  %2509 = vmatmul.mubr.msk.bf16.vlgmr.msra.gmra.mrb[48].mxu0 %vm1574_vm5, %v1557_v48 }
 0x802   :  { %v2651_v2 = vpop.eup %2650  ;;  %2662 = vtanh.f32 %v1521_v32 }
 0x803   :  { %v2653_v42 = vpop.eup %2652  ;;  %2664 = vtanh.f32 %v1513_v33 }
 0x804   :  { %v2655_v43 = vpop.eup %2654 }
 0x805   :  { %v2657_v52 = vpop.eup %2656  ;;  %v2504_v36 = vpop.f32.mrb[44].mxu1  ;;  %v1559_v44 = vpack.c.bf16 %v2655_v43, %v2651_v2 }
 0x806   :  { %v1534_v1 = vadd.f32 %v2504_v36, %v2251_v17  ;;  %v1525_v57 = vpop.f32.mrb[45].mxu1  ;;  %v1558_v15 = vpack.c.bf16 %v2657_v52, %v2653_v42 }
 0x807   :  { %v1526_v7 = vadd.f32 %v2251_v17, %v1525_v57  ;;  %v2505_v45 = vpop.f32.mrb[46].mxu1 }
 0x808   :  { %2666 = vtanh.f32 %v1534_v1  ;;  %v1537_v54 = vadd.f32 %v2505_v45, %v2251_v17  ;;  %v1528_v50 = vpop.f32.mrb[47].mxu1  ;;  %2512 = vmatprep.mubr.msk.bf16.mxu0 %vm1574_vm5, %v1558_v15 }
 0x809   :  { %2668 = vtanh.f32 %v1526_v7  ;;  %v1529_v39 = vadd.f32 %v2251_v17, %v1528_v50  ;;  %2513 = vmatmul.mubr.msk.bf16.gmra.mrb[52].mxu0 %vm1574_vm5, %v1559_v44 }
 0x80a   :  { %v2659_v61 = vpop.eup %2658  ;;  %2670 = vtanh.f32 %v1537_v54 }
 0x80b   :  { %v2661_v8 = vpop.eup %2660  ;;  %2672 = vtanh.f32 %v1529_v39 }
 0x80c   :  { %v2663_v4 = vpop.eup %2662 }
 0x80d   :  { %v2665_v14 = vpop.eup %2664  ;;  %v1561_v21 = vpack.c.bf16 %v2663_v4, %v2659_v61 }
 0x80e   :  { %v1560_v31 = vpack.c.bf16 %v2665_v14, %v2661_v8 }
 0x810   :  { %2516 = vmatprep.mubr.msk.bf16.mxu0 %vm1574_vm5, %v1560_v31 }
 0x811   :  { %2517 = vmatmul.mubr.msk.bf16.gmra.mrb[56].mxu0 %vm1574_vm5, %v1561_v21 }
 0x812   :  { %v2667_v25 = vpop.eup %2666 }
 0x813   :  { %v2669_v55 = vpop.eup %2668 }
 0x814   :  { %v2671_v34 = vpop.eup %2670 }
 0x815   :  { %v2673_v20 = vpop.eup %2672  ;;  %v1563_v9 = vpack.c.bf16 %v2671_v34, %v2667_v25 }
 0x816   :  { %v1562_v17 = vpack.c.bf16 %v2673_v20, %v2669_v55 }
 0x818   :  { %2520 = vmatprep.mubr.msk.bf16.mxu0 %vm1574_vm5, %v1562_v17 }
 0x819   :  { %2521 = vmatmul.mubr.msk.bf16.gmra.mrb[60].mxu0 %vm1574_vm5, %v1563_v9 }
 0x8d4   :  { %v2510_v12 = vpop.f32.mrb[48].mxu0 }
 0x8d5   :  { %v1642_v30 = vadd.f32 %v2510_v12, %v3606_v60  ;;  %v1633_v53 = vpop.f32.mrb[49].mxu0 }
 0x8d6   :  { %v1634_v0 = vadd.f32 %v3606_v60, %v1633_v53  ;;  %v2511_v46 = vpop.f32.mrb[50].mxu0 }
 0x8d7   :  { %v1645_v35 = vadd.f32 %v2511_v46, %v3606_v60  ;;  %v1636_v26 = vpop.f32.mrb[51].mxu0  ;;  %v1706_v19 = vsel %vm1696_vm6, %v1642_v30, -inf }
 0x8d8   :  { %v1637_v56 = vadd.f32 %v3606_v60, %v1636_v26  ;;  %v1697_v3 = vsel %vm1696_vm6, %v1634_v0, -inf }
 0x8d9   :  { %v1707_v5 = vsel %vm1696_vm6, %v1645_v35, -inf }
 0x8da   :  { %v1708_v48 = vmax.f32 %v1706_v19, %v1707_v5  ;;  %v1698_v63 = vsel %vm1696_vm6, %v1637_v56, -inf }
 0x8db   :  { %v1699_v18 = vmax.f32 %v1697_v3, %v1698_v63 }
 0x8dc   :  { %v1709_v58 = vrot.slane %v1708_v48, 4  ;;  %v2514_v38 = vpop.f32.mrb[52].mxu0 }
 0x8dd   :  { %v1700_v28 = vrot.slane %v1699_v18, 4  ;;  %v3617_v29 = vadd.f32 %v2514_v38, %v3606_v60  ;;  %v1649_v32 = vpop.f32.mrb[53].mxu0 }
 0x8de   :  { %v1710_v49 = vmax.f32 %v1708_v48, %v1709_v58  ;;  %v3620_v33 = vadd.f32 %v3606_v60, %v1649_v32  ;;  %v2515_v2 = vpop.f32.mrb[54].mxu0 }
 0x8df   :  { %v1701_v42 = vmax.f32 %v1699_v18, %v1700_v28  ;;  %v3623_v43 = vadd.f32 %v2515_v2, %v3606_v60  ;;  %v1652_v52 = vpop.f32.mrb[55].mxu0  ;;  %v1724_v57 = vsel %vm1696_vm6, %v3617_v29, -inf }
 0x8e0   :  { %v1711_v36 = vrot.slane %v1710_v49, 2  ;;  %v3626_v44 = vadd.f32 %v3606_v60, %v1652_v52  ;;  %v1715_v45 = vsel %vm1696_vm6, %v3620_v33, -inf }
 0x8e1   :  { %v1702_v1 = vrot.slane %v1701_v42, 2  ;;  %v1725_v15 = vsel %vm1696_vm6, %v3623_v43, -inf }
 0x8e2   :  { %v1712_v7 = vmax.f32 %v1710_v49, %v1711_v36  ;;  %v1726_v54 = vmax.f32 %v1724_v57, %v1725_v15  ;;  %v1716_v50 = vsel %vm1696_vm6, %v3626_v44, -inf }
 0x8e3   :  { %v1703_v39 = vmax.f32 %v1701_v42, %v1702_v1  ;;  %v1717_v61 = vmax.f32 %v1715_v45, %v1716_v50 }
 0x8e4   :  { %v1713_v8 = vrot.slane %v1712_v7, 1  ;;  %v1727_v4 = vrot.slane %v1726_v54, 4  ;;  %v2518_v14 = vpop.f32.mrb[56].mxu0 }
 0x8e5   :  { %v1704_v21 = vrot.slane %v1703_v39, 1  ;;  %v1718_v31 = vrot.slane %v1717_v61, 4  ;;  %v3637_v25 = vadd.f32 %v2518_v14, %v3606_v60  ;;  %v1665_v55 = vpop.f32.mrb[57].mxu0 }
 0x8e6   :  { %v1714_v34 = vmax.f32 %v1712_v7, %v1713_v8  ;;  %v1728_v20 = vmax.f32 %v1726_v54, %v1727_v4  ;;  %v2519_v9 = vpop.f32.mrb[58].mxu0  ;;  %v3640_v53 = vadd.f32 %v3606_v60, %v1665_v55 }
 0x8e7   :  { %v1705_v17 = vmax.f32 %v1703_v39, %v1704_v21  ;;  %v1719_v12 = vmax.f32 %v1717_v61, %v1718_v31  ;;  %v3643_v46 = vadd.f32 %v2519_v9, %v3606_v60  ;;  %v1668_v26 = vpop.f32.mrb[59].mxu0  ;;  %v1742_v48 = vsel %vm1696_vm6, %v3637_v25, -inf }
 0x8e8   :  { %v1771_v19 = vsub.f32 %v1642_v30, %v1714_v34  ;;  %v1772_v5 = vsub.f32 %v1645_v35, %v1714_v34  ;;  %v1729_v3 = vrot.slane %v1728_v20, 2  ;;  %v3650_v30 = vadd.f32 %v3606_v60, %v1668_v26 }
 0x8e9   :  { %v1769_v63 = vsub.f32 %v1634_v0, %v1705_v17  ;;  %v1770_v18 = vsub.f32 %v1637_v56, %v1705_v17  ;;  %v1720_v58 = vrot.slane %v1719_v12, 2  ;;  %v1743_v38 = vsel %vm1696_vm6, %v3643_v46, -inf }
 0x8ea   :  { %v1789_v28 = vmul.f32 1.442695, %v1771_v19  ;;  %v1791_v32 = vmul.f32 1.442695, %v1772_v5  ;;  %v1730_v49 = vmax.f32 %v1728_v20, %v1729_v3  ;;  %v1744_v2 = vmax.f32 %v1742_v48, %v1743_v38 }
 0x8eb   :  { %v1785_v42 = vmul.f32 1.442695, %v1769_v63  ;;  %v1787_v52 = vmul.f32 1.442695, %v1770_v18  ;;  %v1721_v36 = vmax.f32 %v1719_v12, %v1720_v58  ;;  %v1733_v0 = vsel %vm1696_vm6, %v3640_v53, -inf }
 0x8ec   :  { %2674 = vpow2.f32 %v1789_v28  ;;  %v1731_v35 = vrot.slane %v1730_v49, 1  ;;  %v1745_v56 = vrot.slane %v1744_v2, 4  ;;  %v2522_v1 = vpop.f32.mrb[60].mxu0  ;;  %v1734_v15 = vsel %vm1696_vm6, %v3650_v30, -inf }
 0x8ed   :  { %2676 = vpow2.f32 %v1791_v32  ;;  %v1722_v57 = vrot.slane %v1721_v36, 1  ;;  %v3657_v7 = vadd.f32 %v2522_v1, %v3606_v60  ;;  %v1681_v45 = vpop.f32.mrb[61].mxu0  ;;  %v1735_v39 = vmax.f32 %v1733_v0, %v1734_v15 }
 0x8ee   :  { %2678 = vpow2.f32 %v1785_v42  ;;  %v1732_v54 = vmax.f32 %v1730_v49, %v1731_v35  ;;  %v1746_v50 = vmax.f32 %v1744_v2, %v1745_v56  ;;  %v2523_v61 = vpop.f32.mrb[62].mxu0  ;;  %v3666_v17 = vadd.f32 %v3606_v60, %v1681_v45 }
 0x8ef   :  { %2680 = vpow2.f32 %v1787_v52  ;;  %v1723_v8 = vmax.f32 %v1721_v36, %v1722_v57  ;;  %v1760_v4 = vsel %vm1696_vm6, %v3657_v7, -inf  ;;  %v1684_v14 = vpop.f32.mrb[63].mxu0  ;;  %v1736_v34 = vrot.slane %v1735_v39, 4 }
 0x8f0   :  { %v1775_v21 = vsub.f32 %v3617_v29, %v1732_v54  ;;  %v1776_v31 = vsub.f32 %v3623_v43, %v1732_v54  ;;  %v1747_v55 = vrot.slane %v1746_v50, 2  ;;  %v3669_v12 = vadd.f32 %v2523_v61, %v3606_v60 }
 0x8f1   :  { %v1773_v20 = vsub.f32 %v3620_v33, %v1723_v8  ;;  %v1774_v9 = vsub.f32 %v3626_v44, %v1723_v8  ;;  %v1737_v3 = vmax.f32 %v1735_v39, %v1736_v34  ;;  %v3674_v63 = vadd.f32 %v3606_v60, %v1684_v14 }
 0x8f2   :  { %v1797_v26 = vmul.f32 1.442695, %v1775_v21  ;;  %v1799_v19 = vmul.f32 1.442695, %v1776_v31  ;;  %v1748_v5 = vmax.f32 %v1746_v50, %v1747_v55  ;;  %v1761_v43 = vsel %vm1696_vm6, %v3669_v12, -inf }
 0x8f3   :  { %v1793_v48 = vmul.f32 1.442695, %v1773_v20  ;;  %v1795_v29 = vmul.f32 1.442695, %v1774_v9  ;;  %v1738_v44 = vrot.slane %v1737_v3, 2  ;;  %v1762_v18 = vmax.f32 %v1760_v4, %v1761_v43 }
 0x8f4   :  { %2682 = vpow2.f32 %v1797_v26  ;;  %v1749_v33 = vrot.slane %v1748_v5, 1  ;;  %v1751_v58 = vsel %vm1696_vm6, %v3666_v17, -inf  ;;  %v1752_v38 = vsel %vm1696_vm6, %v3674_v63, -inf }
 0x8f5   :  { %2684 = vpow2.f32 %v1799_v19  ;;  %v1739_v49 = vmax.f32 %v1737_v3, %v1738_v44  ;;  %v1763_v2 = vrot.slane %v1762_v18, 4  ;;  %v1753_v52 = vmax.f32 %v1751_v58, %v1752_v38 }
 0x8f6   :  { %v3680_v28 = vpop.eup %2674  ;;  %2686 = vpow2.f32 %v1793_v48  ;;  %v1750_v32 = vmax.f32 %v1748_v5, %v1749_v33 }
 0x8f7   :  { %v3682_v42 = vpop.eup %2676  ;;  %v1826_v60 = vsel %vm1696_vm6, %v3680_v28, 0.0  ;;  %2688 = vpow2.f32 %v1795_v29  ;;  %v1740_v1 = vrot.slane %v1739_v49, 1  ;;  %v1764_v54 = vmax.f32 %v1762_v18, %v1763_v2 }
 0x8f8   :  { %v3686_v36 = vpop.eup %2678  ;;  %v1827_v35 = vsel %vm1696_vm6, %v3682_v42, 0.0  ;;  %v1779_v0 = vsub.f32 %v3637_v25, %v1750_v32  ;;  %v1780_v56 = vsub.f32 %v3643_v46, %v1750_v32  ;;  %v1754_v50 = vrot.slane %v1753_v52, 4 }
 0x8f9   :  { %v3692_v57 = vpop.eup %2680  ;;  %v1828_v15 = vadd.f32 %v1827_v35, %v1826_v60  ;;  %v1817_v45 = vsel %vm1696_vm6, %v3686_v36, 0.0  ;;  %v1741_v4 = vmax.f32 %v1739_v49, %v1740_v1  ;;  %v1765_v25 = vrot.slane %v1764_v54, 2 }
 0x8fa   :  { %v1818_v39 = vsel %vm1696_vm6, %v3692_v57, 0.0  ;;  %v1805_v61 = vmul.f32 1.442695, %v1779_v0  ;;  %v1807_v8 = vmul.f32 1.442695, %v1780_v56  ;;  %v1755_v31 = vmax.f32 %v1753_v52, %v1754_v50 }
 0x8fb   :  { %v1829_v14 = vrot.slane %v1828_v15, 4  ;;  %v1819_v21 = vadd.f32 %v1818_v39, %v1817_v45  ;;  %v1777_v46 = vsub.f32 %v3640_v53, %v1741_v4  ;;  %v1778_v55 = vsub.f32 %v3650_v30, %v1741_v4 }
 0x8fc   :  { %2690 = vpow2.f32 %v1805_v61  ;;  %v1766_v9 = vmax.f32 %v1764_v54, %v1765_v25  ;;  %v1756_v3 = vrot.slane %v1755_v31, 2 }
 0x8fd   :  { %v1830_v34 = vadd.f32 %v1829_v14, %v1828_v15  ;;  %v1820_v20 = vrot.slane %v1819_v21, 4  ;;  %2692 = vpow2.f32 %v1807_v8  ;;  %v1801_v19 = vmul.f32 1.442695, %v1777_v46 }
 0x8fe   :  { %v3700_v26 = vpop.eup %2682  ;;  %v1803_v5 = vmul.f32 1.442695, %v1778_v55  ;;  %v1767_v33 = vrot.slane %v1766_v9, 1  ;;  %v1757_v18 = vmax.f32 %v1755_v31, %v1756_v3 }
 0x8ff   :  { %v3702_v48 = vpop.eup %2684  ;;  %v1821_v29 = vadd.f32 %v1820_v20, %v1819_v21  ;;  %v1844_v43 = vsel %vm1696_vm6, %v3700_v26, 0.0  ;;  %v1831_v44 = vrot.slane %v1830_v34, 2  ;;  %2694 = vpow2.f32 %v1801_v19 }
 0x900   :  { %v3706_v53 = vpop.eup %2686  ;;  %v1845_v30 = vsel %vm1696_vm6, %v3702_v48, 0.0  ;;  %2696 = vpow2.f32 %v1803_v5  ;;  %v1768_v49 = vmax.f32 %v1766_v9, %v1767_v33  ;;  %v1758_v60 = vrot.slane %v1757_v18, 1 }
 0x901   :  { %v3710_v58 = vpop.eup %2688  ;;  %v1846_v38 = vadd.f32 %v1845_v30, %v1844_v43  ;;  %v1835_v32 = vsel %vm1696_vm6, %v3706_v53, 0.0  ;;  %v1822_v52 = vrot.slane %v1821_v29, 2  ;;  %v1832_v35 = vadd.f32 %v1831_v44, %v1830_v34 }
 0x902   :  { %v1836_v2 = vsel %vm1696_vm6, %v3710_v58, 0.0  ;;  %v1783_v1 = vsub.f32 %v3657_v7, %v1768_v49  ;;  %v1784_v15 = vsub.f32 %v3669_v12, %v1768_v49  ;;  %v1759_v45 = vmax.f32 %v1757_v18, %v1758_v60 }
 0x903   :  { %v1847_v0 = vrot.slane %v1846_v38, 4  ;;  %v1837_v56 = vadd.f32 %v1836_v2, %v1835_v32  ;;  %v1823_v54 = vadd.f32 %v1822_v52, %v1821_v29  ;;  %v1833_v50 = vrot.slane %v1832_v35, 1 }
 0x904   :  { %v1813_v8 = vmul.f32 1.442695, %v1783_v1  ;;  %v1815_v4 = vmul.f32 1.442695, %v1784_v15  ;;  %v1781_v21 = vsub.f32 %v3666_v17, %v1759_v45  ;;  %v1782_v25 = vsub.f32 %v3674_v63, %v1759_v45 }
 0x905   :  { %v1848_v39 = vadd.f32 %v1847_v0, %v1846_v38  ;;  %v1838_v61 = vrot.slane %v1837_v56, 4  ;;  %v1824_v31 = vrot.slane %v1823_v54, 1  ;;  %v1834_v46 = vadd.f32 %v1833_v50, %v1832_v35 }
 0x906   :  { %v3718_v14 = vpop.eup %2690  ;;  %2698 = vpow2.f32 %v1813_v8  ;;  %v1809_v9 = vmul.f32 1.442695, %v1781_v21  ;;  %v1811_v19 = vmul.f32 1.442695, %v1782_v25 }
 0x907   :  { %v3722_v55 = vpop.eup %2692  ;;  %v1839_v7 = vadd.f32 %v1838_v61, %v1837_v56  ;;  %v1862_v12 = vsel %vm1696_vm6, %v3718_v14, 0.0  ;;  %v1849_v34 = vrot.slane %v1848_v39, 2  ;;  %2700 = vpow2.f32 %v1815_v4 }
 0x908   :  { %v1863_v20 = vsel %vm1696_vm6, %v3722_v55, 0.0  ;;  %v1825_v17 = vadd.f32 %v1824_v31, %v1823_v54  ;;  %2702 = vrcp.f32 %v1834_v46 }
 0x909   :  { %v1864_v5 = vadd.f32 %v1863_v20, %v1862_v12  ;;  %v1840_v63 = vrot.slane %v1839_v7, 2  ;;  %v3728_v3 = vpop.eup %2694  ;;  %2704 = vpow2.f32 %v1809_v9  ;;  %v1850_v29 = vadd.f32 %v1849_v34, %v1848_v39 }
 0x90a   :  { %v3730_v43 = vpop.eup %2696  ;;  %v1853_v44 = vsel %vm1696_vm6, %v3728_v3, 0.0  ;;  %2706 = vpow2.f32 %v1811_v19 }
 0x90b   :  { %v1865_v33 = vrot.slane %v1864_v5, 4  ;;  %v1841_v30 = vadd.f32 %v1840_v63, %v1839_v7  ;;  %v1854_v18 = vsel %vm1696_vm6, %v3730_v43, 0.0  ;;  %2708 = vrcp.f32 %v1825_v17 }
 0x90c   :  { %v1851_v38 = vrot.slane %v1850_v29, 1  ;;  %v1855_v49 = vadd.f32 %v1854_v18, %v1853_v44 }
 0x90d   :  { %v1866_v32 = vadd.f32 %v1865_v33, %v1864_v5  ;;  %v1842_v2 = vrot.slane %v1841_v30, 1 }
 0x90e   :  { %v1852_v60 = vadd.f32 %v1851_v38, %v1850_v29  ;;  %v1856_v52 = vrot.slane %v1855_v49, 4 }
 0x90f   :  { %v1843_v35 = vadd.f32 %v1842_v2, %v1841_v30  ;;  %v1867_v0 = vrot.slane %v1866_v32, 2 }
 0x910   :  { %2710 = vrcp.f32 %v1852_v60  ;;  %v3736_v56 = vpop.eup %2698  ;;  %v1857_v1 = vadd.f32 %v1856_v52, %v1855_v49 }
 0x911   :  { %2712 = vrcp.f32 %v1843_v35  ;;  %v1868_v15 = vadd.f32 %v1867_v0, %v1866_v32  ;;  %v3738_v45 = vpop.eup %2700  ;;  %v1880_v54 = vsel %vm1696_vm6, %v3736_v56, 0.0 }
 0x912   :  { %v2703_v50 = vpop.eup %2702  ;;  %v1881_v39 = vsel %vm1696_vm6, %v3738_v45, 0.0  ;;  %v1858_v61 = vrot.slane %v1857_v1, 2 }
 0x913   :  { %v1869_v8 = vrot.slane %v1868_v15, 1  ;;  %v3744_v4 = vpop.eup %2704  ;;  %v1882_v21 = vadd.f32 %v1881_v39, %v1880_v54  ;;  %v1899_v25 = vmul.f32 %v2703_v50, %v3680_v28  ;;  %v1900_v31 = vmul.f32 %v2703_v50, %v3682_v42 }
 0x914   :  { %v3748_v46 = vpop.eup %2706  ;;  %v1871_v7 = vsel %vm1696_vm6, %v3744_v4, 0.0  ;;  %v1859_v12 = vadd.f32 %v1858_v61, %v1857_v1 }
 0x915   :  { %v1870_v34 = vadd.f32 %v1869_v8, %v1868_v15  ;;  %v2709_v20 = vpop.eup %2708  ;;  %v1883_v9 = vrot.slane %v1882_v21, 4  ;;  %v1872_v19 = vsel %vm1696_vm6, %v3748_v46, 0.0  ;;  %v1919_v35 = vsel %vm1696_vm6, %v1899_v25, 0.0 }
 0x916   :  { %v1873_v5 = vadd.f32 %v1872_v19, %v1871_v7  ;;  %v1898_v17 = vmul.f32 %v2709_v20, %v3692_v57  ;;  %v1897_v63 = vmul.f32 %v2709_v20, %v3686_v36  ;;  %v1860_v28 = vrot.slane %v1859_v12, 1 }
 0x917   :  { %v1884_v29 = vadd.f32 %v1883_v9, %v1882_v21  ;;  %2714 = vrcp.f32 %v1870_v34  ;;  %v1922_v0 = vsel %vm1696_vm6, %v1900_v31, 0.0 }
 0x918   :  { %v1874_v42 = vrot.slane %v1873_v5, 4  ;;  %v1916_v33 = vsel %vm1696_vm6, %v1898_v17, 0.0  ;;  %v1913_v44 = vsel %vm1696_vm6, %v1897_v63, 0.0  ;;  %v1861_v30 = vadd.f32 %v1860_v28, %v1859_v12 }
 0x919   :  { %1917 = vadd.xlane.f32.xlu0 %v1916_v33  ;;  %1914 = vadd.xlane.f32.xlu1 %v1913_v44  ;;  %v1885_v38 = vrot.slane %v1884_v29, 2  ;;  %v2728_v17 = vmov 0.0  }
 0x91a   :  { %v2711_v18 = vpop.eup %2710  ;;  %v1875_v49 = vadd.f32 %v1874_v42, %v1873_v5  ;;  %2716 = vrcp.f32 %v1861_v30  ;;  %2524 = vmatprep.subr.bf16.mxu1 %v2728_v17  ;;  %2544 = vmatprep.subr.bf16.mxu0 %v2728_v17  ;;  %v2724_v42 = vld [vmem:[%s3912_s3 + $0x8] sm:$0xff]  }
 0x91b   :  { %v2713_v32 = vpop.eup %2712  ;;  %v1903_v2 = vmul.f32 %v2711_v18, %v3700_v26  ;;  %v1904_v57 = vmul.f32 %v2711_v18, %v3702_v48  ;;  %v1886_v52 = vadd.f32 %v1885_v38, %v1884_v29  ;;  %2540 = vmatprep.mubr.msk.bf16.mxu1 %vm2731_vm7, %v2728_v17  ;;  %2548 = vmatprep.mubr.msk.bf16.mxu0 %vm2731_vm7, %v2728_v17 }
 0x91c   :  { %v1901_v36 = vmul.f32 %v2713_v32, %v3706_v53  ;;  %v1902_v60 = vmul.f32 %v2713_v32, %v3710_v58  ;;  %v1876_v1 = vrot.slane %v1875_v49, 2 }
 0x91d   :  { %1920 = vadd.xlane.f32.xlu0 %v1919_v35  ;;  %1923 = vadd.xlane.f32.xlu1 %v1922_v0  ;;  %v1887_v15 = vrot.slane %v1886_v52, 1  ;;  %v1931_v25 = vsel %vm1696_vm6, %v1903_v2, 0.0  ;;  %v1934_v31 = vsel %vm1696_vm6, %v1904_v57, 0.0 }
 0x91e   :  { %v1925_v54 = vsel %vm1696_vm6, %v1901_v36, 0.0  ;;  %v1928_v26 = vsel %vm1696_vm6, %v1902_v60, 0.0  ;;  %v1877_v50 = vadd.f32 %v1876_v1, %v1875_v49 }
 0x91f   :  { %v1888_v48 = vadd.f32 %v1887_v15, %v1886_v52 }
 0x920   :  { %v1878_v39 = vrot.slane %v1877_v50, 1 }
 0x921   :  { %v2715_v61 = vpop.eup %2714  ;;  %1926 = vadd.xlane.f32.xlu0 %v1925_v54  ;;  %1929 = vadd.xlane.f32.xlu1 %v1928_v26  ;;  %2718 = vrcp.f32 %v1888_v48 }
 0x922   :  { %v1907_v53 = vmul.f32 %v2715_v61, %v3718_v14  ;;  %v1908_v58 = vmul.f32 %v2715_v61, %v3722_v55  ;;  %v1879_v8 = vadd.f32 %v1878_v39, %v1877_v50 }
 0x924   :  { %v2717_v21 = vpop.eup %2716  ;;  %2720 = vrcp.f32 %v1879_v8  ;;  %v1943_v55 = vsel %vm1696_vm6, %v1907_v53, 0.0  ;;  %v1946_v9 = vsel %vm1696_vm6, %v1908_v58, 0.0 }
 0x925   :  { %1932 = vadd.xlane.f32.xlu0 %v1931_v25  ;;  %1935 = vadd.xlane.f32.xlu1 %v1934_v31  ;;  %v1905_v7 = vmul.f32 %v2717_v21, %v3728_v3  ;;  %v1906_v12 = vmul.f32 %v2717_v21, %v3730_v43 }
 0x927   :  { %v1937_v34 = vsel %vm1696_vm6, %v1905_v7, 0.0  ;;  %v1940_v20 = vsel %vm1696_vm6, %v1906_v12, 0.0 }
 0x929   :  { %1938 = vadd.xlane.f32.xlu0 %v1937_v34  ;;  %1941 = vadd.xlane.f32.xlu1 %v1940_v20 }
 0x92b   :  { %v2719_v14 = vpop.eup %2718 }
 0x92c   :  { %v1911_v19 = vmul.f32 %v2719_v14, %v3736_v56  ;;  %v1912_v5 = vmul.f32 %v2719_v14, %v3738_v45 }
 0x92d   :  { %1944 = vadd.xlane.f32.xlu0 %v1943_v55  ;;  %1947 = vadd.xlane.f32.xlu1 %v1946_v9 }
 0x92e   :  { %v2721_v3 = vpop.eup %2720  ;;  %v1955_v56 = vsel %vm1696_vm6, %v1911_v19, 0.0  ;;  %v1958_v45 = vsel %vm1696_vm6, %v1912_v5, 0.0 }
 0x92f   :  { %v1909_v43 = vmul.f32 %v2721_v3, %v3744_v4  ;;  %v1910_v63 = vmul.f32 %v2721_v3, %v3748_v46  ;;  %v2725_v4 = vld [vmem:[%s3912_s3] sm:$0xff]  }
 0x931   :  { %v1949_v28 = vsel %vm1696_vm6, %v1909_v43, 0.0  ;;  %v1952_v29 = vsel %vm1696_vm6, %v1910_v63, 0.0 }
 0x932   :  { %1950 = vadd.xlane.f32.xlu0 %v1949_v28  ;;  %1953 = vadd.xlane.f32.xlu1 %v1952_v29 }
 0x936   :  { %1956 = vadd.xlane.f32.xlu0 %v1955_v56  ;;  %1959 = vadd.xlane.f32.xlu1 %v1958_v45 }
 0x947   :  { %2049 = vrot.lane.b32.xlu1 %v2724_v42, %s2729_s1 }
 0x94b   :  { %2129 = vrot.lane.b32.xlu1 %v3479_v41, %s2730_s27 }
 0x94c   :  { %2047 = vrot.lane.b32.xlu0 %v2725_v4, %s2729_s1 }
 0x94f   :  { %2131 = vrot.lane.b32.xlu1 %v3482_v27, %s2730_s27 }
 0x950   :  { %2133 = vrot.lane.b32.xlu0 %v3501_v16, %s2730_s27 }
 0x953   :  { %2135 = vrot.lane.b32.xlu1 %v3511_v47, %s2730_s27 }
 0x954   :  { %2137 = vrot.lane.b32.xlu0 %v3505_v10, %s2730_s27 }
 0x957   :  { %2139 = vrot.lane.b32.xlu1 %v3508_v37, %s2730_s27 }
 0x958   :  { %2141 = vrot.lane.b32.xlu0 %v3530_v51, %s2730_s27 }
 0x95b   :  { %2143 = vrot.lane.b32.xlu1 %v3533_v59, %s2730_s27 }
 0x95c   :  { %2145 = vrot.lane.b32.xlu0 %v3538_v22, %s2730_s27 }
 0x95f   :  { %2147 = vrot.lane.b32.xlu1 %v3541_v40, %s2730_s27 }
 0x960   :  { %2149 = vrot.lane.b32.xlu0 %v3561_v23, %s2730_s27 }
 0x963   :  { %2151 = vrot.lane.b32.xlu1 %v3564_v6, %s2730_s27 }
 0x964   :  { %2153 = vrot.lane.b32.xlu0 %v3567_v13, %s2730_s27 }
 0x967   :  { %2155 = vrot.lane.b32.xlu1 %v3570_v62, %s2730_s27 }
 0x968   :  { %2157 = vrot.lane.b32.xlu0 %v3581_v11, %s2730_s27 }
 0x96b   :  { %2159 = vrot.lane.b32.xlu1 %v3584_v24, %s2730_s27 }
 0x9a6   :  { %v1918_v46 = vpop.xlane.xlu0 %1917  ;;  %v1915_v33 = vpop.xlane.xlu1 %1914 }
 0x9a7   :  { %v1963_v44 = vmul.f32 0.25, %v1918_v46  ;;  %v1962_v30 = vmul.f32 0.25, %v1915_v33 }
 0x9a9   :  { %v1979_v18 = vmul.f32 %v1963_v44, %v3482_v27  ;;  %v1978_v38 = vmul.f32 %v1962_v30, %v3479_v41 }
 0x9aa   :  { %v1921_v32 = vpop.xlane.xlu0 %1920  ;;  %v1924_v49 = vpop.xlane.xlu1 %1923 }
 0x9ab   :  { %v1994_v2 = vpack.c.bf16 %v1979_v18, %v1978_v38  ;;  %v1964_v57 = vmul.f32 0.25, %v1921_v32  ;;  %v1965_v36 = vmul.f32 0.25, %v1924_v49 }
 0x9ad   :  { %v1980_v60 = vmul.f32 %v1964_v57, %v3501_v16  ;;  %v1981_v52 = vmul.f32 %v1965_v36, %v3511_v47  ;;  %2525 = vmatpush3.bf16.msra.mxu1 %v1994_v2 }
 0x9ae   :  { %v1927_v35 = vpop.xlane.xlu0 %1926  ;;  %v1930_v0 = vpop.xlane.xlu1 %1929  ;;  %2526 = vmatprep.subr.bf16.mxu1 %v2728_v17 }
 0x9af   :  { %v1995_v1 = vpack.c.bf16 %v1981_v52, %v1980_v60  ;;  %v1966_v15 = vmul.f32 0.25, %v1927_v35  ;;  %v1967_v54 = vmul.f32 0.25, %v1930_v0 }
 0x9b1   :  { %v1982_v27 = vmul.f32 %v1966_v15, %v3505_v10  ;;  %v1983_v41 = vmul.f32 %v1967_v54, %v3508_v37  ;;  %2527 = vmatpush3.bf16.msra.mxu1 %v1995_v1  ;;  %v2270_v15 = vld [vmem:[%s3913_s6 + $0x9] ss:$0 sm:$0xff] }
 0x9b2   :  { %v1933_v26 = vpop.xlane.xlu0 %1932  ;;  %v1936_v50 = vpop.xlane.xlu1 %1935  ;;  %2528 = vmatprep.subr.bf16.mxu1 %v2728_v17 }
 0x9b3   :  { %v1996_v16 = vpack.c.bf16 %v1983_v41, %v1982_v27  ;;  %v1968_v48 = vmul.f32 0.25, %v1933_v26  ;;  %v1969_v47 = vmul.f32 0.25, %v1936_v50 }
 0x9b5   :  { %v1984_v39 = vmul.f32 %v1968_v48, %v3530_v51  ;;  %v1985_v61 = vmul.f32 %v1969_v47, %v3533_v59  ;;  %2529 = vmatpush3.bf16.msra.mxu1 %v1996_v16 }
 0x9b6   :  { %v1939_v53 = vpop.xlane.xlu0 %1938  ;;  %v1942_v58 = vpop.xlane.xlu1 %1941  ;;  %2530 = vmatprep.subr.bf16.mxu1 %v2728_v17 }
 0x9b7   :  { %v1997_v10 = vpack.c.bf16 %v1985_v61, %v1984_v39  ;;  %v1970_v8 = vmul.f32 0.25, %v1939_v53  ;;  %v1971_v37 = vmul.f32 0.25, %v1942_v58 }
 0x9b9   :  { %v1986_v21 = vmul.f32 %v1970_v8, %v3538_v22  ;;  %v1987_v25 = vmul.f32 %v1971_v37, %v3541_v40  ;;  %2531 = vmatpush3.bf16.msra.mxu1 %v1997_v10 }
 0x9ba   :  { %v1945_v31 = vpop.xlane.xlu0 %1944  ;;  %v1948_v7 = vpop.xlane.xlu1 %1947  ;;  %2532 = vmatprep.subr.bf16.mxu1 %v2728_v17 }
 0x9bb   :  { %v1998_v51 = vpack.c.bf16 %v1987_v25, %v1986_v21  ;;  %v1972_v12 = vmul.f32 0.25, %v1945_v31  ;;  %v1973_v59 = vmul.f32 0.25, %v1948_v7 }
 0x9bd   :  { %v1988_v34 = vmul.f32 %v1972_v12, %v3561_v23  ;;  %v1989_v20 = vmul.f32 %v1973_v59, %v3564_v6  ;;  %2533 = vmatpush3.bf16.msra.mxu1 %v1998_v51 }
 0x9be   :  { %2534 = vmatprep.subr.bf16.mxu1 %v2728_v17 }
 0x9bf   :  { %v1999_v14 = vpack.c.bf16 %v1989_v20, %v1988_v34  ;;  %v1951_v55 = vpop.xlane.xlu0 %1950  ;;  %v1954_v22 = vpop.xlane.xlu1 %1953 }
 0x9c0   :  { %v1974_v9 = vmul.f32 0.25, %v1951_v55  ;;  %v1975_v40 = vmul.f32 0.25, %v1954_v22 }
 0x9c1   :  { %2535 = vmatpush3.bf16.msra.mxu1 %v1999_v14 }
 0x9c2   :  { %v1990_v19 = vmul.f32 %v1974_v9, %v3567_v13  ;;  %v1991_v5 = vmul.f32 %v1975_v40, %v3570_v62  ;;  %2536 = vmatprep.subr.bf16.mxu1 %v2728_v17  ;;  %v61_v13 = vld [vmem:[%s3916_s2] sm:$0xf] }
 0x9c3   :  { %v1957_v3 = vpop.xlane.xlu0 %1956  ;;  %v1960_v43 = vpop.xlane.xlu1 %1959 }
 0x9c4   :  { %v2000_v23 = vpack.c.bf16 %v1991_v5, %v1990_v19  ;;  %v1976_v63 = vmul.f32 0.25, %v1957_v3  ;;  %v1977_v6 = vmul.f32 0.25, %v1960_v43 }
 0x9c6   :  { %v1992_v28 = vmul.f32 %v1976_v63, %v3581_v11  ;;  %v1993_v29 = vmul.f32 %v1977_v6, %v3584_v24  ;;  %2537 = vmatpush3.bf16.msra.mxu1 %v2000_v23 }
 0x9c7   :  { %v2048_v56 = vpop.permute.xlu0 %2047  ;;  %v2050_v45 = vpop.permute.xlu1 %2049  ;;  %2538 = vmatprep.subr.bf16.mxu1 %v2728_v17 }
 0x9c8   :  { %v2001_v42 = vpack.c.bf16 %v1993_v29, %v1992_v28  ;;  %2545 = vmatpush3.bf16.msra.mxu0 %v2048_v56 }
 0x9c9   :  { %2546 = vmatprep.subr.bf16.mxu0 %v2728_v17 }
 0x9ca   :  { %2539 = vmatpush3.bf16.msra.mxu1 %v2001_v42 }
 0x9cb   :  { %v2134_v62 = vpop.permute.xlu0 %2133  ;;  %v2130_v4 = vpop.permute.xlu1 %2129 }
 0x9cc   :  { %2180 = vst.msk [vmem:[%s3914_s8 + $0x10] sm:$0xff] %vm2177_vm8, %v2134_v62  ;;  %2178 = vst.msk [vmem:[%s3914_s8] sm:$0xff] %vm2177_vm8, %v2130_v4  ;;  %2547 = vmatpush3.bf16.msra.mxu0 %v2050_v45 }
 0x9cd   :  { %2541 = vmatmul.mubr.bf16.vlgmr.msra.gmra.mrb[48].mxu1 %v61_v13 }
 0x9cf   :  { %v2138_v11 = vpop.permute.xlu0 %2137  ;;  %v2132_v24 = vpop.permute.xlu1 %2131 }
 0x9d0   :  { %2182 = vst.msk [vmem:[%s3914_s8 + $0x20] sm:$0xff] %vm2177_vm8, %v2138_v11  ;;  %2179 = vst.msk [vmem:[%s3914_s8 + $0x8] sm:$0xff] %vm2177_vm8, %v2132_v24 }
 0x9d3   :  { %v2142_v17 = vpop.permute.xlu0 %2141  ;;  %v2136_v46 = vpop.permute.xlu1 %2135 }
 0x9d4   :  { %2184 = vst.msk [vmem:[%s3914_s8 + $0x30] sm:$0xff] %vm2177_vm8, %v2142_v17  ;;  %2181 = vst.msk [vmem:[%s3914_s8 + $0x18] sm:$0xff] %vm2177_vm8, %v2136_v46 }
 0x9d7   :  { %v2146_v33 = vpop.permute.xlu0 %2145  ;;  %v2140_v44 = vpop.permute.xlu1 %2139 }
 0x9d8   :  { %2186 = vst.msk [vmem:[%s3914_s8 + $0x40] sm:$0xff] %vm2177_vm8, %v2146_v33  ;;  %2183 = vst.msk [vmem:[%s3914_s8 + $0x28] sm:$0xff] %vm2177_vm8, %v2140_v44 }
 0x9db   :  { %v2150_v30 = vpop.permute.xlu0 %2149  ;;  %v2144_v18 = vpop.permute.xlu1 %2143 }
 0x9dc   :  { %2188 = vst.msk [vmem:[%s3914_s8 + $0x50] sm:$0xff] %vm2177_vm8, %v2150_v30  ;;  %2185 = vst.msk [vmem:[%s3914_s8 + $0x38] sm:$0xff] %vm2177_vm8, %v2144_v18 }
 0x9df   :  { %v2154_v38 = vpop.permute.xlu0 %2153  ;;  %v2148_v32 = vpop.permute.xlu1 %2147 }
 0x9e0   :  { %2190 = vst.msk [vmem:[%s3914_s8 + $0x60] sm:$0xff] %vm2177_vm8, %v2154_v38  ;;  %2187 = vst.msk [vmem:[%s3914_s8 + $0x48] sm:$0xff] %vm2177_vm8, %v2148_v32 }
 0x9e3   :  { %v2158_v49 = vpop.permute.xlu0 %2157  ;;  %v2152_v2 = vpop.permute.xlu1 %2151 }
 0x9e4   :  { %2192 = vst.msk [vmem:[%s3914_s8 + $0x70] sm:$0xff] %vm2177_vm8, %v2158_v49  ;;  %2189 = vst.msk [vmem:[%s3914_s8 + $0x58] sm:$0xff] %vm2177_vm8, %v2152_v2 }
 0x9e7   :  { %v2156_v57 = vpop.permute.xlu1 %2155 }
 0x9e8   :  { %2191 = vst.msk [vmem:[%s3914_s8 + $0x68] sm:$0xff] %vm2177_vm8, %v2156_v57 }
 0x9eb   :  { %v2160_v36 = vpop.permute.xlu1 %2159 }
 0x9ec   :  { %2193 = vst.msk [vmem:[%s3914_s8 + $0x78] sm:$0xff] %vm2177_vm8, %v2160_v36 }
 0xaa0   :  { %v2036_v60 = vpop.f32.mrb[48].mxu1 }
 0xaa1   :  { %v2042_v52 = vpack.c.bf16 %v2036_v60, %v2036_v60  ;;  %v2542_v35 = vpop.f32.mrb[49].mxu1 }
 0xaa2   :  { %v2039_v0 = vpop.f32.mrb[50].mxu1 }
 0xaa3   :  { %v2543_v1 = vpop.f32.mrb[51].mxu1  ;;  %2549 = vmatmul.mubr.msk.bf16.vlgmr.msra.gmra.mrb[64].mxu0 %vm426_vm2, %v2042_v52 }
 0xb76   :  { %v2090_v54 = vpop.f32.mrb[64].mxu0 }
 0xb77   :  { %v2091_v27 = vadd.f32 %v2270_v15, %v2090_v54  ;;  %v2550_v41 = vpop.f32.mrb[65].mxu0 }
 0xb78   :  { %v2093_v26 = vpop.f32.mrb[66].mxu0 }
 0xb79   :  { %2096 = vst.msk [vmem:[%s3917_s7] sm:$0xff] %vm1696_vm6, %v2091_v27  ;;  %v2551_v50 = vpop.f32.mrb[67].mxu0 }

</bundles_post_ra>
